<compile_context>
chip_gen: v6e
topology: v6e:2x2x1
jax: 0.10.0
libtpu: 0.0.40
codegen_flags: <defaults>
</compile_context>

<pallas_src>
import jax
import jax.numpy as jnp
from jax.experimental import pallas as pl
from jax.experimental.pallas import tpu as pltpu


def rnn_forward(title, context, lengths, params):
    """Forward pass matching the PyTorch RNN module."""
    del lengths  # unused in the PyTorch forward (no pack_padded_sequence)

    emb_table = params["embedding"]                     # (vocab, E)
    embedded = jnp.take(emb_table, title, axis=0)       # (S, B, E) -- glue gather

    S, B, E = embedded.shape
    H = params["w_hh"].shape[0] // 3
    C = context.shape[1]
    O = params["w_fc"].shape[0]                         # 5

    # Padded, lane-aligned sizes.
    BP = max(8, ((B + 7) // 8) * 8)                     # batch -> sublane multiple of 8
    GP = max(128, ((H + 127) // 128) * 128)             # per-gate / hidden lane width
    CP = max(128, ((C + 127) // 128) * 128)             # context lane width
    OP = max(128, ((O + 127) // 128) * 128)             # output lane width (lane-dense store)

    f32 = jnp.float32

    # --- pad inputs (wrapper-side glue) -------------------------------------
    emb_p = jnp.zeros((S, BP, E), f32).at[:, :B, :].set(embedded.astype(f32))
    x_flat = emb_p.reshape(S * BP, E)                   # (S*BP, E)

    ctx_p = jnp.zeros((BP, CP), f32).at[:B, :C].set(context.astype(f32))

    # --- GRU weights: PyTorch layout W_ih (3H, E), W_hh (3H, H), gates [r,z,n]
    w_ih, w_hh = params["w_ih"], params["w_hh"]
    b_ih, b_hh = params["b_ih"], params["b_hh"]

    wih_p = jnp.zeros((E, 3 * GP), f32)                 # x -> [r | z | n], each GP lanes
    whh_p = jnp.zeros((GP, 3 * GP), f32)                # h -> [r | z | n]
    gib_p = jnp.zeros((1, 3 * GP), f32)                 # fused input-side bias
    bhn_p = jnp.zeros((1, GP), f32)                     # b_hn (stays inside r*(...))
    for g in range(3):
        wih_p = wih_p.at[:, g * GP:g * GP + H].set(w_ih[g * H:(g + 1) * H, :].T)
        whh_p = whh_p.at[:H, g * GP:g * GP + H].set(w_hh[g * H:(g + 1) * H, :].T)
    # r, z gates get b_ih + b_hh folded; n gate gets only b_in here.
    gib_p = gib_p.at[0, 0:H].set(b_ih[0:H] + b_hh[0:H])
    gib_p = gib_p.at[0, GP:GP + H].set(b_ih[H:2 * H] + b_hh[H:2 * H])
    gib_p = gib_p.at[0, 2 * GP:2 * GP + H].set(b_ih[2 * H:3 * H])
    bhn_p = bhn_p.at[0, :H].set(b_hh[2 * H:3 * H])

    # --- FC weights: W_fc (5, H + C) split into hidden / context parts, padded
    w_fc, b_fc = params["w_fc"], params["b_fc"]
    wfh_p = jnp.zeros((GP, OP), f32).at[:H, :O].set(w_fc[:, :H].T)
    wfc_p = jnp.zeros((CP, OP), f32).at[:C, :O].set(w_fc[:, H:].T)
    bf_p = jnp.zeros((1, OP), f32).at[0, :O].set(b_fc)

    # --- kernel --------------------------------------------------------------
    def gru_fc_kernel(x_ref, wih_ref, whh_ref, gib_ref, bhn_ref,
                      ctx_ref, wfh_ref, wfc_ref, bf_ref,
                      out_ref, gi_scr):
        # Phase 1 (non-recurrent): input projection for all S steps in ONE matmul.
        gi_scr[...] = (
            jnp.dot(x_ref[...], wih_ref[...], preferred_element_type=jnp.float32)
            + gib_ref[...]
        )

        whh = whh_ref[...]                                       # (GP, 3*GP)
        bhn = jnp.broadcast_to(bhn_ref[...], (BP, GP))           # hoisted out of loop
        h0 = jnp.zeros((BP, GP), jnp.float32)

        # Phase 2 (recurrent): only h @ W_hh^T on the serial path.
        def step(t, h):
            start = pl.multiple_of(t * BP, BP)
            gi = gi_scr[pl.ds(start, BP), :]                     # (BP, 3*GP)
            gh = jnp.dot(h, whh, preferred_element_type=jnp.float32)
            i_r, i_z, i_n = gi[:, :GP], gi[:, GP:2 * GP], gi[:, 2 * GP:]
            h_r, h_z, h_n = gh[:, :GP], gh[:, GP:2 * GP], gh[:, 2 * GP:]
            r = jax.nn.sigmoid(i_r + h_r)
            z = jax.nn.sigmoid(i_z + h_z)
            n = jnp.tanh(i_n + r * (h_n + bhn))
            return (1.0 - z) * n + z * h

        h_final = jax.lax.fori_loop(0, S, step, h0, unroll=True)

        # Phase 3: fused Linear on concat([h, context]) as two matmuls,
        # lane-dense (BP, OP) output slab.
        out_ref[...] = (
            jnp.dot(h_final, wfh_ref[...], preferred_element_type=jnp.float32)
            + jnp.dot(ctx_ref[...], wfc_ref[...], preferred_element_type=jnp.float32)
            + bf_ref[...]
        )

    full = lambda i: (0, 0)
    out_padded = pl.pallas_call(
        gru_fc_kernel,
        out_shape=jax.ShapeDtypeStruct((BP, OP), jnp.float32),
        grid_spec=pltpu.PrefetchScalarGridSpec(
            num_scalar_prefetch=0,
            grid=(1,),                                  # single invocation; time loop is in-kernel
            in_specs=[
                pl.BlockSpec((S * BP, E), full),        # x (all time steps)
                pl.BlockSpec((E, 3 * GP), full),        # W_ih^T (gate-padded)
                pl.BlockSpec((GP, 3 * GP), full),       # W_hh^T (gate-padded)
                pl.BlockSpec((1, 3 * GP), full),        # fused input-side bias
                pl.BlockSpec((1, GP), full),            # b_hn
                pl.BlockSpec((BP, CP), full),           # context (padded)
                pl.BlockSpec((GP, OP), full),           # W_fc hidden part^T (padded)
                pl.BlockSpec((CP, OP), full),           # W_fc context part^T (padded)
                pl.BlockSpec((1, OP), full),            # b_fc (padded)
            ],
            out_specs=pl.BlockSpec((BP, OP), full),
            scratch_shapes=[pltpu.VMEM((S * BP, 3 * GP), jnp.float32)],
        ),
        compiler_params=pltpu.CompilerParams(
            dimension_semantics=("arbitrary",),
        ),
    )(x_flat, wih_p, whh_p, gib_p, bhn_p, ctx_p, wfh_p, wfc_p, bf_p)

    return out_padded[:B, :O]


def rnn_reference(title, context, params):
    """Pure-JAX reference of the same forward, for correctness checking."""
    emb = jnp.take(params["embedding"], title, axis=0)          # (S, B, E)
    H = params["w_hh"].shape[0] // 3
    w_ih_t, w_hh_t = params["w_ih"].T, params["w_hh"].T
    b_ih, b_hh = params["b_ih"], params["b_hh"]

    def step(h, x):
        gi = x @ w_ih_t + b_ih
        gh = h @ w_hh_t + b_hh
        i_r, i_z, i_n = gi[:, :H], gi[:, H:2 * H], gi[:, 2 * H:]
        h_r, h_z, h_n = gh[:, :H], gh[:, H:2 * H], gh[:, 2 * H:]
        r = jax.nn.sigmoid(i_r + h_r)
        z = jax.nn.sigmoid(i_z + h_z)
        n = jnp.tanh(i_n + r * h_n)
        h_new = (1.0 - z) * n + z * h
        return h_new, None

    h0 = jnp.zeros((title.shape[1], H), jnp.float32)
    h_final, _ = jax.lax.scan(step, h0, emb)
    withcontext = jnp.concatenate([h_final, context], axis=1)
    return withcontext @ params["w_fc"].T + params["b_fc"]


if __name__ == "__main__":
    # small, deterministic setup
    SEQ, BATCH = 8, 2
    EMB, HIDDEN = 16, 32
    VOCAB = 50
    NUM_CTX = 2 + 24 + 7  # 33

    key = jax.random.PRNGKey(0)
    keys = jax.random.split(key, 10)

    params = {
        "embedding": jax.random.normal(keys[0], (VOCAB, EMB), jnp.float32) * 0.1,
        "w_ih": jax.random.normal(keys[1], (3 * HIDDEN, EMB), jnp.float32) * 0.1,
        "w_hh": jax.random.normal(keys[2], (3 * HIDDEN, HIDDEN), jnp.float32) * 0.1,
        "b_ih": jax.random.normal(keys[3], (3 * HIDDEN,), jnp.float32) * 0.1,
        "b_hh": jax.random.normal(keys[4], (3 * HIDDEN,), jnp.float32) * 0.1,
        "w_fc": jax.random.normal(keys[5], (5, HIDDEN + NUM_CTX), jnp.float32) * 0.1,
        "b_fc": jax.random.normal(keys[6], (5,), jnp.float32) * 0.1,
    }

    title = jax.random.randint(keys[7], (SEQ, BATCH), 0, VOCAB, dtype=jnp.int32)
    context = jax.random.normal(keys[8], (BATCH, NUM_CTX), jnp.float32)
    lengths = jnp.full((BATCH,), SEQ, dtype=jnp.int32)  # unused by forward

    out = rnn_forward(title, context, lengths, params)
    out = jax.block_until_ready(out)

    ref = rnn_reference(title, context, params)
    assert out.shape == (BATCH, 5)
    assert jnp.allclose(out, ref, atol=1e-5, rtol=1e-5), "mismatch vs reference"

    print("KERNEL_OK")
</pallas_src>

<mosaic_0001>
module attributes {stable_mosaic.version = 11 : i64} {
  func.func @gru_fc_kernel(%arg0: i32, %arg1: memref<64x16xf32, #tpu.memory_space<vmem>>, %arg2: memref<16x384xf32, #tpu.memory_space<vmem>>, %arg3: memref<128x384xf32, #tpu.memory_space<vmem>>, %arg4: memref<1x384xf32, #tpu.memory_space<vmem>>, %arg5: memref<1x128xf32, #tpu.memory_space<vmem>>, %arg6: memref<8x128xf32, #tpu.memory_space<vmem>>, %arg7: memref<128x128xf32, #tpu.memory_space<vmem>>, %arg8: memref<128x128xf32, #tpu.memory_space<vmem>>, %arg9: memref<1x128xf32, #tpu.memory_space<vmem>>, %arg10: memref<8x128xf32, #tpu.memory_space<vmem>>, %arg11: memref<64x384xf32, #tpu.memory_space<vmem>>) attributes {dimension_semantics = [#tpu.dimension_semantics<arbitrary>], iteration_bounds = array<i64: 1>, scalar_prefetch = 0 : i64, scratch_operands = 1 : i64, tpu.core_type = #tpu.core_type<tc>, window_params = [{pipeline_mode = #tpu.pipeline_mode<synchronous>, transform_indices = @transform_0, window_bounds = array<i64: 64, 16>}, {pipeline_mode = #tpu.pipeline_mode<synchronous>, transform_indices = @transform_1, window_bounds = array<i64: 16, 384>}, {pipeline_mode = #tpu.pipeline_mode<synchronous>, transform_indices = @transform_2, window_bounds = array<i64: 128, 384>}, {pipeline_mode = #tpu.pipeline_mode<synchronous>, transform_indices = @transform_3, window_bounds = array<i64: 1, 384>}, {pipeline_mode = #tpu.pipeline_mode<synchronous>, transform_indices = @transform_4, window_bounds = array<i64: 1, 128>}, {pipeline_mode = #tpu.pipeline_mode<synchronous>, transform_indices = @transform_5, window_bounds = array<i64: 8, 128>}, {pipeline_mode = #tpu.pipeline_mode<synchronous>, transform_indices = @transform_6, window_bounds = array<i64: 128, 128>}, {pipeline_mode = #tpu.pipeline_mode<synchronous>, transform_indices = @transform_7, window_bounds = array<i64: 128, 128>}, {pipeline_mode = #tpu.pipeline_mode<synchronous>, transform_indices = @transform_8, window_bounds = array<i64: 1, 128>}, {pipeline_mode = #tpu.pipeline_mode<synchronous>, transform_indices = @transform_9, window_bounds = array<i64: 8, 128>}]} {
    %c0 = arith.constant 0 : index
    %c0_0 = arith.constant 0 : index
    %0 = vector.load %arg1[%c0, %c0_0] : memref<64x16xf32, #tpu.memory_space<vmem>>, vector<64x16xf32>
    %c0_1 = arith.constant 0 : index
    %c0_2 = arith.constant 0 : index
    %1 = vector.load %arg2[%c0_1, %c0_2] : memref<16x384xf32, #tpu.memory_space<vmem>>, vector<16x384xf32>
    %cst = arith.constant dense<0.000000e+00> : vector<64x384xf32>
    %2 = tpu.matmul %0, %1, %cst {dimension_numbers = #tpu.dot_dimension_numbers<[1], [0], [0], [1], [0, 0, 1, 1], [], []>} : vector<64x16xf32>, vector<16x384xf32>, vector<64x384xf32> -> vector<64x384xf32>
    %c0_3 = arith.constant 0 : index
    %c0_4 = arith.constant 0 : index
    %3 = vector.load %arg4[%c0_3, %c0_4] : memref<1x384xf32, #tpu.memory_space<vmem>>, vector<1x384xf32>
    %4 = vector.broadcast %3 : vector<1x384xf32> to vector<64x384xf32>
    %5 = arith.addf %2, %4 : vector<64x384xf32>
    %c0_5 = arith.constant 0 : index
    %c0_6 = arith.constant 0 : index
    %6 = vector.load %arg11[%c0_5, %c0_6] : memref<64x384xf32, #tpu.memory_space<vmem>>, vector<64x384xf32>
    tpu.vector_store %arg11[%c0_5, %c0_6], %5 {strides = array<i32>} : memref<64x384xf32, #tpu.memory_space<vmem>>, vector<64x384xf32>,
    %c0_7 = arith.constant 0 : index
    %c0_8 = arith.constant 0 : index
    %7 = vector.load %arg3[%c0_7, %c0_8] : memref<128x384xf32, #tpu.memory_space<vmem>>, vector<128x384xf32>
    %c0_9 = arith.constant 0 : index
    %c0_10 = arith.constant 0 : index
    %8 = vector.load %arg5[%c0_9, %c0_10] : memref<1x128xf32, #tpu.memory_space<vmem>>, vector<1x128xf32>
    %9 = vector.shape_cast %8 : vector<1x128xf32> to vector<1x128xf32>
    %10 = vector.broadcast %9 : vector<1x128xf32> to vector<8x128xf32>
    %cst_11 = arith.constant 0.000000e+00 : f32
    %11 = vector.broadcast %cst_11 : f32 to vector<8x128xf32>
    %c0_i32 = arith.constant 0 : i32
    %c8_i32 = arith.constant 8 : i32
    %12 = arith.muli %c0_i32, %c8_i32 : i32
    %13 = tpu.assume_multiple %12, 8 : i32
    %14 = arith.index_cast %13 : i32 to index
    %c0_12 = arith.constant 0 : index
    %15 = vector.load %arg11[%14, %c0_12] : memref<64x384xf32, #tpu.memory_space<vmem>>, vector<8x384xf32>
    %cst_13 = arith.constant dense<0.000000e+00> : vector<8x384xf32>
    %16 = tpu.matmul %11, %7, %cst_13 {dimension_numbers = #tpu.dot_dimension_numbers<[1], [0], [0], [1], [0, 0, 1, 1], [], []>} : vector<8x128xf32>, vector<128x384xf32>, vector<8x384xf32> -> vector<8x384xf32>
    %17 = vector.extract_strided_slice %15 {offsets = [0, 0], sizes = [8, 128], strides = [1, 1]} : vector<8x384xf32> to vector<8x128xf32>
    %18 = vector.extract_strided_slice %15 {offsets = [0, 128], sizes = [8, 128], strides = [1, 1]} : vector<8x384xf32> to vector<8x128xf32>
    %19 = vector.extract_strided_slice %15 {offsets = [0, 256], sizes = [8, 128], strides = [1, 1]} : vector<8x384xf32> to vector<8x128xf32>
    %20 = vector.extract_strided_slice %16 {offsets = [0, 0], sizes = [8, 128], strides = [1, 1]} : vector<8x384xf32> to vector<8x128xf32>
    %21 = vector.extract_strided_slice %16 {offsets = [0, 128], sizes = [8, 128], strides = [1, 1]} : vector<8x384xf32> to vector<8x128xf32>
    %22 = vector.extract_strided_slice %16 {offsets = [0, 256], sizes = [8, 128], strides = [1, 1]} : vector<8x384xf32> to vector<8x128xf32>
    %23 = arith.addf %17, %20 : vector<8x128xf32>
    %24 = arith.negf %23 : vector<8x128xf32>
    %25 = math.exp %24 : vector<8x128xf32>
    %cst_14 = arith.constant 1.000000e+00 : f32
    %26 = vector.broadcast %cst_14 : f32 to vector<8x128xf32>
    %27 = arith.addf %26, %25 : vector<8x128xf32>
    %28 = arith.divf %26, %27 : vector<8x128xf32>
    %29 = arith.addf %18, %21 : vector<8x128xf32>
    %30 = arith.negf %29 : vector<8x128xf32>
    %31 = math.exp %30 : vector<8x128xf32>
    %cst_15 = arith.constant 1.000000e+00 : f32
    %32 = vector.broadcast %cst_15 : f32 to vector<8x128xf32>
    %33 = arith.addf %32, %31 : vector<8x128xf32>
    %34 = arith.divf %32, %33 : vector<8x128xf32>
    %35 = arith.addf %22, %10 : vector<8x128xf32>
    %36 = arith.mulf %28, %35 : vector<8x128xf32>
    %37 = arith.addf %19, %36 : vector<8x128xf32>
    %38 = math.tanh %37 : vector<8x128xf32>
    %cst_16 = arith.constant 1.000000e+00 : f32
    %39 = vector.broadcast %cst_16 : f32 to vector<8x128xf32>
    %40 = arith.subf %39, %34 : vector<8x128xf32>
    %41 = arith.mulf %40, %38 : vector<8x128xf32>
    %42 = arith.mulf %34, %11 : vector<8x128xf32>
    %43 = arith.addf %41, %42 : vector<8x128xf32>
    %c1_i32 = arith.constant 1 : i32
    %c8_i32_17 = arith.constant 8 : i32
    %44 = arith.muli %c1_i32, %c8_i32_17 : i32
    %45 = tpu.assume_multiple %44, 8 : i32
    %46 = arith.index_cast %45 : i32 to index
    %c0_18 = arith.constant 0 : index
    %47 = vector.load %arg11[%46, %c0_18] : memref<64x384xf32, #tpu.memory_space<vmem>>, vector<8x384xf32>
    %cst_19 = arith.constant dense<0.000000e+00> : vector<8x384xf32>
    %48 = tpu.matmul %43, %7, %cst_19 {dimension_numbers = #tpu.dot_dimension_numbers<[1], [0], [0], [1], [0, 0, 1, 1], [], []>} : vector<8x128xf32>, vector<128x384xf32>, vector<8x384xf32> -> vector<8x384xf32>
    %49 = vector.extract_strided_slice %47 {offsets = [0, 0], sizes = [8, 128], strides = [1, 1]} : vector<8x384xf32> to vector<8x128xf32>
    %50 = vector.extract_strided_slice %47 {offsets = [0, 128], sizes = [8, 128], strides = [1, 1]} : vector<8x384xf32> to vector<8x128xf32>
    %51 = vector.extract_strided_slice %47 {offsets = [0, 256], sizes = [8, 128], strides = [1, 1]} : vector<8x384xf32> to vector<8x128xf32>
    %52 = vector.extract_strided_slice %48 {offsets = [0, 0], sizes = [8, 128], strides = [1, 1]} : vector<8x384xf32> to vector<8x128xf32>
    %53 = vector.extract_strided_slice %48 {offsets = [0, 128], sizes = [8, 128], strides = [1, 1]} : vector<8x384xf32> to vector<8x128xf32>
    %54 = vector.extract_strided_slice %48 {offsets = [0, 256], sizes = [8, 128], strides = [1, 1]} : vector<8x384xf32> to vector<8x128xf32>
    %55 = arith.addf %49, %52 : vector<8x128xf32>
    %56 = arith.negf %55 : vector<8x128xf32>
    %57 = math.exp %56 : vector<8x128xf32>
    %cst_20 = arith.constant 1.000000e+00 : f32
    %58 = vector.broadcast %cst_20 : f32 to vector<8x128xf32>
    %59 = arith.addf %58, %57 : vector<8x128xf32>
    %60 = arith.divf %58, %59 : vector<8x128xf32>
    %61 = arith.addf %50, %53 : vector<8x128xf32>
    %62 = arith.negf %61 : vector<8x128xf32>
    %63 = math.exp %62 : vector<8x128xf32>
    %cst_21 = arith.constant 1.000000e+00 : f32
    %64 = vector.broadcast %cst_21 : f32 to vector<8x128xf32>
    %65 = arith.addf %64, %63 : vector<8x128xf32>
    %66 = arith.divf %64, %65 : vector<8x128xf32>
    %67 = arith.addf %54, %10 : vector<8x128xf32>
    %68 = arith.mulf %60, %67 : vector<8x128xf32>
    %69 = arith.addf %51, %68 : vector<8x128xf32>
    %70 = math.tanh %69 : vector<8x128xf32>
    %cst_22 = arith.constant 1.000000e+00 : f32
    %71 = vector.broadcast %cst_22 : f32 to vector<8x128xf32>
    %72 = arith.subf %71, %66 : vector<8x128xf32>
    %73 = arith.mulf %72, %70 : vector<8x128xf32>
    %74 = arith.mulf %66, %43 : vector<8x128xf32>
    %75 = arith.addf %73, %74 : vector<8x128xf32>
    %c2_i32 = arith.constant 2 : i32
    %c8_i32_23 = arith.constant 8 : i32
    %76 = arith.muli %c2_i32, %c8_i32_23 : i32
    %77 = tpu.assume_multiple %76, 8 : i32
    %78 = arith.index_cast %77 : i32 to index
    %c0_24 = arith.constant 0 : index
    %79 = vector.load %arg11[%78, %c0_24] : memref<64x384xf32, #tpu.memory_space<vmem>>, vector<8x384xf32>
    %cst_25 = arith.constant dense<0.000000e+00> : vector<8x384xf32>
    %80 = tpu.matmul %75, %7, %cst_25 {dimension_numbers = #tpu.dot_dimension_numbers<[1], [0], [0], [1], [0, 0, 1, 1], [], []>} : vector<8x128xf32>, vector<128x384xf32>, vector<8x384xf32> -> vector<8x384xf32>
    %81 = vector.extract_strided_slice %79 {offsets = [0, 0], sizes = [8, 128], strides = [1, 1]} : vector<8x384xf32> to vector<8x128xf32>
    %82 = vector.extract_strided_slice %79 {offsets = [0, 128], sizes = [8, 128], strides = [1, 1]} : vector<8x384xf32> to vector<8x128xf32>
    %83 = vector.extract_strided_slice %79 {offsets = [0, 256], sizes = [8, 128], strides = [1, 1]} : vector<8x384xf32> to vector<8x128xf32>
    %84 = vector.extract_strided_slice %80 {offsets = [0, 0], sizes = [8, 128], strides = [1, 1]} : vector<8x384xf32> to vector<8x128xf32>
    %85 = vector.extract_strided_slice %80 {offsets = [0, 128], sizes = [8, 128], strides = [1, 1]} : vector<8x384xf32> to vector<8x128xf32>
    %86 = vector.extract_strided_slice %80 {offsets = [0, 256], sizes = [8, 128], strides = [1, 1]} : vector<8x384xf32> to vector<8x128xf32>
    %87 = arith.addf %81, %84 : vector<8x128xf32>
    %88 = arith.negf %87 : vector<8x128xf32>
    %89 = math.exp %88 : vector<8x128xf32>
    %cst_26 = arith.constant 1.000000e+00 : f32
    %90 = vector.broadcast %cst_26 : f32 to vector<8x128xf32>
    %91 = arith.addf %90, %89 : vector<8x128xf32>
    %92 = arith.divf %90, %91 : vector<8x128xf32>
    %93 = arith.addf %82, %85 : vector<8x128xf32>
    %94 = arith.negf %93 : vector<8x128xf32>
    %95 = math.exp %94 : vector<8x128xf32>
    %cst_27 = arith.constant 1.000000e+00 : f32
    %96 = vector.broadcast %cst_27 : f32 to vector<8x128xf32>
    %97 = arith.addf %96, %95 : vector<8x128xf32>
    %98 = arith.divf %96, %97 : vector<8x128xf32>
    %99 = arith.addf %86, %10 : vector<8x128xf32>
    %100 = arith.mulf %92, %99 : vector<8x128xf32>
    %101 = arith.addf %83, %100 : vector<8x128xf32>
    %102 = math.tanh %101 : vector<8x128xf32>
    %cst_28 = arith.constant 1.000000e+00 : f32
    %103 = vector.broadcast %cst_28 : f32 to vector<8x128xf32>
    %104 = arith.subf %103, %98 : vector<8x128xf32>
    %105 = arith.mulf %104, %102 : vector<8x128xf32>
    %106 = arith.mulf %98, %75 : vector<8x128xf32>
    %107 = arith.addf %105, %106 : vector<8x128xf32>
    %c3_i32 = arith.constant 3 : i32
    %c8_i32_29 = arith.constant 8 : i32
    %108 = arith.muli %c3_i32, %c8_i32_29 : i32
    %109 = tpu.assume_multiple %108, 8 : i32
    %110 = arith.index_cast %109 : i32 to index
    %c0_30 = arith.constant 0 : index
    %111 = vector.load %arg11[%110, %c0_30] : memref<64x384xf32, #tpu.memory_space<vmem>>, vector<8x384xf32>
    %cst_31 = arith.constant dense<0.000000e+00> : vector<8x384xf32>
    %112 = tpu.matmul %107, %7, %cst_31 {dimension_numbers = #tpu.dot_dimension_numbers<[1], [0], [0], [1], [0, 0, 1, 1], [], []>} : vector<8x128xf32>, vector<128x384xf32>, vector<8x384xf32> -> vector<8x384xf32>
    %113 = vector.extract_strided_slice %111 {offsets = [0, 0], sizes = [8, 128], strides = [1, 1]} : vector<8x384xf32> to vector<8x128xf32>
    %114 = vector.extract_strided_slice %111 {offsets = [0, 128], sizes = [8, 128], strides = [1, 1]} : vector<8x384xf32> to vector<8x128xf32>
    %115 = vector.extract_strided_slice %111 {offsets = [0, 256], sizes = [8, 128], strides = [1, 1]} : vector<8x384xf32> to vector<8x128xf32>
    %116 = vector.extract_strided_slice %112 {offsets = [0, 0], sizes = [8, 128], strides = [1, 1]} : vector<8x384xf32> to vector<8x128xf32>
    %117 = vector.extract_strided_slice %112 {offsets = [0, 128], sizes = [8, 128], strides = [1, 1]} : vector<8x384xf32> to vector<8x128xf32>
    %118 = vector.extract_strided_slice %112 {offsets = [0, 256], sizes = [8, 128], strides = [1, 1]} : vector<8x384xf32> to vector<8x128xf32>
    %119 = arith.addf %113, %116 : vector<8x128xf32>
    %120 = arith.negf %119 : vector<8x128xf32>
    %121 = math.exp %120 : vector<8x128xf32>
    %cst_32 = arith.constant 1.000000e+00 : f32
    %122 = vector.broadcast %cst_32 : f32 to vector<8x128xf32>
    %123 = arith.addf %122, %121 : vector<8x128xf32>
    %124 = arith.divf %122, %123 : vector<8x128xf32>
    %125 = arith.addf %114, %117 : vector<8x128xf32>
    %126 = arith.negf %125 : vector<8x128xf32>
    %127 = math.exp %126 : vector<8x128xf32>
    %cst_33 = arith.constant 1.000000e+00 : f32
    %128 = vector.broadcast %cst_33 : f32 to vector<8x128xf32>
    %129 = arith.addf %128, %127 : vector<8x128xf32>
    %130 = arith.divf %128, %129 : vector<8x128xf32>
    %131 = arith.addf %118, %10 : vector<8x128xf32>
    %132 = arith.mulf %124, %131 : vector<8x128xf32>
    %133 = arith.addf %115, %132 : vector<8x128xf32>
    %134 = math.tanh %133 : vector<8x128xf32>
    %cst_34 = arith.constant 1.000000e+00 : f32
    %135 = vector.broadcast %cst_34 : f32 to vector<8x128xf32>
    %136 = arith.subf %135, %130 : vector<8x128xf32>
    %137 = arith.mulf %136, %134 : vector<8x128xf32>
    %138 = arith.mulf %130, %107 : vector<8x128xf32>
    %139 = arith.addf %137, %138 : vector<8x128xf32>
    %c4_i32 = arith.constant 4 : i32
    %c8_i32_35 = arith.constant 8 : i32
    %140 = arith.muli %c4_i32, %c8_i32_35 : i32
    %141 = tpu.assume_multiple %140, 8 : i32
    %142 = arith.index_cast %141 : i32 to index
    %c0_36 = arith.constant 0 : index
    %143 = vector.load %arg11[%142, %c0_36] : memref<64x384xf32, #tpu.memory_space<vmem>>, vector<8x384xf32>
    %cst_37 = arith.constant dense<0.000000e+00> : vector<8x384xf32>
    %144 = tpu.matmul %139, %7, %cst_37 {dimension_numbers = #tpu.dot_dimension_numbers<[1], [0], [0], [1], [0, 0, 1, 1], [], []>} : vector<8x128xf32>, vector<128x384xf32>, vector<8x384xf32> -> vector<8x384xf32>
    %145 = vector.extract_strided_slice %143 {offsets = [0, 0], sizes = [8, 128], strides = [1, 1]} : vector<8x384xf32> to vector<8x128xf32>
    %146 = vector.extract_strided_slice %143 {offsets = [0, 128], sizes = [8, 128], strides = [1, 1]} : vector<8x384xf32> to vector<8x128xf32>
    %147 = vector.extract_strided_slice %143 {offsets = [0, 256], sizes = [8, 128], strides = [1, 1]} : vector<8x384xf32> to vector<8x128xf32>
    %148 = vector.extract_strided_slice %144 {offsets = [0, 0], sizes = [8, 128], strides = [1, 1]} : vector<8x384xf32> to vector<8x128xf32>
    %149 = vector.extract_strided_slice %144 {offsets = [0, 128], sizes = [8, 128], strides = [1, 1]} : vector<8x384xf32> to vector<8x128xf32>
    %150 = vector.extract_strided_slice %144 {offsets = [0, 256], sizes = [8, 128], strides = [1, 1]} : vector<8x384xf32> to vector<8x128xf32>
    %151 = arith.addf %145, %148 : vector<8x128xf32>
    %152 = arith.negf %151 : vector<8x128xf32>
    %153 = math.exp %152 : vector<8x128xf32>
    %cst_38 = arith.constant 1.000000e+00 : f32
    %154 = vector.broadcast %cst_38 : f32 to vector<8x128xf32>
    %155 = arith.addf %154, %153 : vector<8x128xf32>
    %156 = arith.divf %154, %155 : vector<8x128xf32>
    %157 = arith.addf %146, %149 : vector<8x128xf32>
    %158 = arith.negf %157 : vector<8x128xf32>
    %159 = math.exp %158 : vector<8x128xf32>
    %cst_39 = arith.constant 1.000000e+00 : f32
    %160 = vector.broadcast %cst_39 : f32 to vector<8x128xf32>
    %161 = arith.addf %160, %159 : vector<8x128xf32>
    %162 = arith.divf %160, %161 : vector<8x128xf32>
    %163 = arith.addf %150, %10 : vector<8x128xf32>
    %164 = arith.mulf %156, %163 : vector<8x128xf32>
    %165 = arith.addf %147, %164 : vector<8x128xf32>
    %166 = math.tanh %165 : vector<8x128xf32>
    %cst_40 = arith.constant 1.000000e+00 : f32
    %167 = vector.broadcast %cst_40 : f32 to vector<8x128xf32>
    %168 = arith.subf %167, %162 : vector<8x128xf32>
    %169 = arith.mulf %168, %166 : vector<8x128xf32>
    %170 = arith.mulf %162, %139 : vector<8x128xf32>
    %171 = arith.addf %169, %170 : vector<8x128xf32>
    %c5_i32 = arith.constant 5 : i32
    %c8_i32_41 = arith.constant 8 : i32
    %172 = arith.muli %c5_i32, %c8_i32_41 : i32
    %173 = tpu.assume_multiple %172, 8 : i32
    %174 = arith.index_cast %173 : i32 to index
    %c0_42 = arith.constant 0 : index
    %175 = vector.load %arg11[%174, %c0_42] : memref<64x384xf32, #tpu.memory_space<vmem>>, vector<8x384xf32>
    %cst_43 = arith.constant dense<0.000000e+00> : vector<8x384xf32>
    %176 = tpu.matmul %171, %7, %cst_43 {dimension_numbers = #tpu.dot_dimension_numbers<[1], [0], [0], [1], [0, 0, 1, 1], [], []>} : vector<8x128xf32>, vector<128x384xf32>, vector<8x384xf32> -> vector<8x384xf32>
    %177 = vector.extract_strided_slice %175 {offsets = [0, 0], sizes = [8, 128], strides = [1, 1]} : vector<8x384xf32> to vector<8x128xf32>
    %178 = vector.extract_strided_slice %175 {offsets = [0, 128], sizes = [8, 128], strides = [1, 1]} : vector<8x384xf32> to vector<8x128xf32>
    %179 = vector.extract_strided_slice %175 {offsets = [0, 256], sizes = [8, 128], strides = [1, 1]} : vector<8x384xf32> to vector<8x128xf32>
    %180 = vector.extract_strided_slice %176 {offsets = [0, 0], sizes = [8, 128], strides = [1, 1]} : vector<8x384xf32> to vector<8x128xf32>
    %181 = vector.extract_strided_slice %176 {offsets = [0, 128], sizes = [8, 128], strides = [1, 1]} : vector<8x384xf32> to vector<8x128xf32>
    %182 = vector.extract_strided_slice %176 {offsets = [0, 256], sizes = [8, 128], strides = [1, 1]} : vector<8x384xf32> to vector<8x128xf32>
    %183 = arith.addf %177, %180 : vector<8x128xf32>
    %184 = arith.negf %183 : vector<8x128xf32>
    %185 = math.exp %184 : vector<8x128xf32>
    %cst_44 = arith.constant 1.000000e+00 : f32
    %186 = vector.broadcast %cst_44 : f32 to vector<8x128xf32>
    %187 = arith.addf %186, %185 : vector<8x128xf32>
    %188 = arith.divf %186, %187 : vector<8x128xf32>
    %189 = arith.addf %178, %181 : vector<8x128xf32>
    %190 = arith.negf %189 : vector<8x128xf32>
    %191 = math.exp %190 : vector<8x128xf32>
    %cst_45 = arith.constant 1.000000e+00 : f32
    %192 = vector.broadcast %cst_45 : f32 to vector<8x128xf32>
    %193 = arith.addf %192, %191 : vector<8x128xf32>
    %194 = arith.divf %192, %193 : vector<8x128xf32>
    %195 = arith.addf %182, %10 : vector<8x128xf32>
    %196 = arith.mulf %188, %195 : vector<8x128xf32>
    %197 = arith.addf %179, %196 : vector<8x128xf32>
    %198 = math.tanh %197 : vector<8x128xf32>
    %cst_46 = arith.constant 1.000000e+00 : f32
    %199 = vector.broadcast %cst_46 : f32 to vector<8x128xf32>
    %200 = arith.subf %199, %194 : vector<8x128xf32>
    %201 = arith.mulf %200, %198 : vector<8x128xf32>
    %202 = arith.mulf %194, %171 : vector<8x128xf32>
    %203 = arith.addf %201, %202 : vector<8x128xf32>
    %c6_i32 = arith.constant 6 : i32
    %c8_i32_47 = arith.constant 8 : i32
    %204 = arith.muli %c6_i32, %c8_i32_47 : i32
    %205 = tpu.assume_multiple %204, 8 : i32
    %206 = arith.index_cast %205 : i32 to index
    %c0_48 = arith.constant 0 : index
    %207 = vector.load %arg11[%206, %c0_48] : memref<64x384xf32, #tpu.memory_space<vmem>>, vector<8x384xf32>
    %cst_49 = arith.constant dense<0.000000e+00> : vector<8x384xf32>
    %208 = tpu.matmul %203, %7, %cst_49 {dimension_numbers = #tpu.dot_dimension_numbers<[1], [0], [0], [1], [0, 0, 1, 1], [], []>} : vector<8x128xf32>, vector<128x384xf32>, vector<8x384xf32> -> vector<8x384xf32>
    %209 = vector.extract_strided_slice %207 {offsets = [0, 0], sizes = [8, 128], strides = [1, 1]} : vector<8x384xf32> to vector<8x128xf32>
    %210 = vector.extract_strided_slice %207 {offsets = [0, 128], sizes = [8, 128], strides = [1, 1]} : vector<8x384xf32> to vector<8x128xf32>
    %211 = vector.extract_strided_slice %207 {offsets = [0, 256], sizes = [8, 128], strides = [1, 1]} : vector<8x384xf32> to vector<8x128xf32>
    %212 = vector.extract_strided_slice %208 {offsets = [0, 0], sizes = [8, 128], strides = [1, 1]} : vector<8x384xf32> to vector<8x128xf32>
    %213 = vector.extract_strided_slice %208 {offsets = [0, 128], sizes = [8, 128], strides = [1, 1]} : vector<8x384xf32> to vector<8x128xf32>
    %214 = vector.extract_strided_slice %208 {offsets = [0, 256], sizes = [8, 128], strides = [1, 1]} : vector<8x384xf32> to vector<8x128xf32>
    %215 = arith.addf %209, %212 : vector<8x128xf32>
    %216 = arith.negf %215 : vector<8x128xf32>
    %217 = math.exp %216 : vector<8x128xf32>
    %cst_50 = arith.constant 1.000000e+00 : f32
    %218 = vector.broadcast %cst_50 : f32 to vector<8x128xf32>
    %219 = arith.addf %218, %217 : vector<8x128xf32>
    %220 = arith.divf %218, %219 : vector<8x128xf32>
    %221 = arith.addf %210, %213 : vector<8x128xf32>
    %222 = arith.negf %221 : vector<8x128xf32>
    %223 = math.exp %222 : vector<8x128xf32>
    %cst_51 = arith.constant 1.000000e+00 : f32
    %224 = vector.broadcast %cst_51 : f32 to vector<8x128xf32>
    %225 = arith.addf %224, %223 : vector<8x128xf32>
    %226 = arith.divf %224, %225 : vector<8x128xf32>
    %227 = arith.addf %214, %10 : vector<8x128xf32>
    %228 = arith.mulf %220, %227 : vector<8x128xf32>
    %229 = arith.addf %211, %228 : vector<8x128xf32>
    %230 = math.tanh %229 : vector<8x128xf32>
    %cst_52 = arith.constant 1.000000e+00 : f32
    %231 = vector.broadcast %cst_52 : f32 to vector<8x128xf32>
    %232 = arith.subf %231, %226 : vector<8x128xf32>
    %233 = arith.mulf %232, %230 : vector<8x128xf32>
    %234 = arith.mulf %226, %203 : vector<8x128xf32>
    %235 = arith.addf %233, %234 : vector<8x128xf32>
    %c7_i32 = arith.constant 7 : i32
    %c8_i32_53 = arith.constant 8 : i32
    %236 = arith.muli %c7_i32, %c8_i32_53 : i32
    %237 = tpu.assume_multiple %236, 8 : i32
    %238 = arith.index_cast %237 : i32 to index
    %c0_54 = arith.constant 0 : index
    %239 = vector.load %arg11[%238, %c0_54] : memref<64x384xf32, #tpu.memory_space<vmem>>, vector<8x384xf32>
    %cst_55 = arith.constant dense<0.000000e+00> : vector<8x384xf32>
    %240 = tpu.matmul %235, %7, %cst_55 {dimension_numbers = #tpu.dot_dimension_numbers<[1], [0], [0], [1], [0, 0, 1, 1], [], []>} : vector<8x128xf32>, vector<128x384xf32>, vector<8x384xf32> -> vector<8x384xf32>
    %241 = vector.extract_strided_slice %239 {offsets = [0, 0], sizes = [8, 128], strides = [1, 1]} : vector<8x384xf32> to vector<8x128xf32>
    %242 = vector.extract_strided_slice %239 {offsets = [0, 128], sizes = [8, 128], strides = [1, 1]} : vector<8x384xf32> to vector<8x128xf32>
    %243 = vector.extract_strided_slice %239 {offsets = [0, 256], sizes = [8, 128], strides = [1, 1]} : vector<8x384xf32> to vector<8x128xf32>
    %244 = vector.extract_strided_slice %240 {offsets = [0, 0], sizes = [8, 128], strides = [1, 1]} : vector<8x384xf32> to vector<8x128xf32>
    %245 = vector.extract_strided_slice %240 {offsets = [0, 128], sizes = [8, 128], strides = [1, 1]} : vector<8x384xf32> to vector<8x128xf32>
    %246 = vector.extract_strided_slice %240 {offsets = [0, 256], sizes = [8, 128], strides = [1, 1]} : vector<8x384xf32> to vector<8x128xf32>
    %247 = arith.addf %241, %244 : vector<8x128xf32>
    %248 = arith.negf %247 : vector<8x128xf32>
    %249 = math.exp %248 : vector<8x128xf32>
    %cst_56 = arith.constant 1.000000e+00 : f32
    %250 = vector.broadcast %cst_56 : f32 to vector<8x128xf32>
    %251 = arith.addf %250, %249 : vector<8x128xf32>
    %252 = arith.divf %250, %251 : vector<8x128xf32>
    %253 = arith.addf %242, %245 : vector<8x128xf32>
    %254 = arith.negf %253 : vector<8x128xf32>
    %255 = math.exp %254 : vector<8x128xf32>
    %cst_57 = arith.constant 1.000000e+00 : f32
    %256 = vector.broadcast %cst_57 : f32 to vector<8x128xf32>
    %257 = arith.addf %256, %255 : vector<8x128xf32>
    %258 = arith.divf %256, %257 : vector<8x128xf32>
    %259 = arith.addf %246, %10 : vector<8x128xf32>
    %260 = arith.mulf %252, %259 : vector<8x128xf32>
    %261 = arith.addf %243, %260 : vector<8x128xf32>
    %262 = math.tanh %261 : vector<8x128xf32>
    %cst_58 = arith.constant 1.000000e+00 : f32
    %263 = vector.broadcast %cst_58 : f32 to vector<8x128xf32>
    %264 = arith.subf %263, %258 : vector<8x128xf32>
    %265 = arith.mulf %264, %262 : vector<8x128xf32>
    %266 = arith.mulf %258, %235 : vector<8x128xf32>
    %267 = arith.addf %265, %266 : vector<8x128xf32>
    %c8_i32_59 = arith.constant 8 : i32
    %c0_60 = arith.constant 0 : index
    %c0_61 = arith.constant 0 : index
    %268 = vector.load %arg7[%c0_60, %c0_61] : memref<128x128xf32, #tpu.memory_space<vmem>>, vector<128x128xf32>
    %cst_62 = arith.constant dense<0.000000e+00> : vector<8x128xf32>
    %269 = tpu.matmul %267, %268, %cst_62 {dimension_numbers = #tpu.dot_dimension_numbers<[1], [0], [0], [1], [0, 0, 1, 1], [], []>} : vector<8x128xf32>, vector<128x128xf32>, vector<8x128xf32> -> vector<8x128xf32>
    %c0_63 = arith.constant 0 : index
    %c0_64 = arith.constant 0 : index
    %270 = vector.load %arg6[%c0_63, %c0_64] : memref<8x128xf32, #tpu.memory_space<vmem>>, vector<8x128xf32>
    %c0_65 = arith.constant 0 : index
    %c0_66 = arith.constant 0 : index
    %271 = vector.load %arg8[%c0_65, %c0_66] : memref<128x128xf32, #tpu.memory_space<vmem>>, vector<128x128xf32>
    %cst_67 = arith.constant dense<0.000000e+00> : vector<8x128xf32>
    %272 = tpu.matmul %270, %271, %cst_67 {dimension_numbers = #tpu.dot_dimension_numbers<[1], [0], [0], [1], [0, 0, 1, 1], [], []>} : vector<8x128xf32>, vector<128x128xf32>, vector<8x128xf32> -> vector<8x128xf32>
    %273 = arith.addf %269, %272 : vector<8x128xf32>
    %c0_68 = arith.constant 0 : index
    %c0_69 = arith.constant 0 : index
    %274 = vector.load %arg9[%c0_68, %c0_69] : memref<1x128xf32, #tpu.memory_space<vmem>>, vector<1x128xf32>
    %275 = vector.broadcast %274 : vector<1x128xf32> to vector<8x128xf32>
    %276 = arith.addf %273, %275 : vector<8x128xf32>
    %c0_70 = arith.constant 0 : index
    %c0_71 = arith.constant 0 : index
    %277 = vector.load %arg10[%c0_70, %c0_71] : memref<8x128xf32, #tpu.memory_space<vmem>>, vector<8x128xf32>
    tpu.vector_store %arg10[%c0_70, %c0_71], %276 {strides = array<i32>} : memref<8x128xf32, #tpu.memory_space<vmem>>, vector<8x128xf32>,
    return
  }
  func.func @transform_0(%arg0: i32) -> (i32, i32) {
    %c0_i32 = arith.constant 0 : i32
    %c0_i32_0 = arith.constant 0 : i32
    %c0_i32_1 = arith.constant 0 : i32
    return %c0_i32, %c0_i32_0 : i32, i32
  }
  func.func @transform_1(%arg0: i32) -> (i32, i32) {
    %c0_i32 = arith.constant 0 : i32
    %c0_i32_0 = arith.constant 0 : i32
    %c0_i32_1 = arith.constant 0 : i32
    return %c0_i32, %c0_i32_0 : i32, i32
  }
  func.func @transform_2(%arg0: i32) -> (i32, i32) {
    %c0_i32 = arith.constant 0 : i32
    %c0_i32_0 = arith.constant 0 : i32
    %c0_i32_1 = arith.constant 0 : i32
    return %c0_i32, %c0_i32_0 : i32, i32
  }
  func.func @transform_3(%arg0: i32) -> (i32, i32) {
    %c0_i32 = arith.constant 0 : i32
    %c0_i32_0 = arith.constant 0 : i32
    %c0_i32_1 = arith.constant 0 : i32
    return %c0_i32, %c0_i32_0 : i32, i32
  }
  func.func @transform_4(%arg0: i32) -> (i32, i32) {
    %c0_i32 = arith.constant 0 : i32
    %c0_i32_0 = arith.constant 0 : i32
    %c0_i32_1 = arith.constant 0 : i32
    return %c0_i32, %c0_i32_0 : i32, i32
  }
  func.func @transform_5(%arg0: i32) -> (i32, i32) {
    %c0_i32 = arith.constant 0 : i32
    %c0_i32_0 = arith.constant 0 : i32
    %c0_i32_1 = arith.constant 0 : i32
    return %c0_i32, %c0_i32_0 : i32, i32
  }
  func.func @transform_6(%arg0: i32) -> (i32, i32) {
    %c0_i32 = arith.constant 0 : i32
    %c0_i32_0 = arith.constant 0 : i32
    %c0_i32_1 = arith.constant 0 : i32
    return %c0_i32, %c0_i32_0 : i32, i32
  }
  func.func @transform_7(%arg0: i32) -> (i32, i32) {
    %c0_i32 = arith.constant 0 : i32
    %c0_i32_0 = arith.constant 0 : i32
    %c0_i32_1 = arith.constant 0 : i32
    return %c0_i32, %c0_i32_0 : i32, i32
  }
  func.func @transform_8(%arg0: i32) -> (i32, i32) {
    %c0_i32 = arith.constant 0 : i32
    %c0_i32_0 = arith.constant 0 : i32
    %c0_i32_1 = arith.constant 0 : i32
    return %c0_i32, %c0_i32_0 : i32, i32
  }
  func.func @transform_9(%arg0: i32) -> (i32, i32) {
    %c0_i32 = arith.constant 0 : i32
    %c0_i32_0 = arith.constant 0 : i32
    %c0_i32_1 = arith.constant 0 : i32
    return %c0_i32, %c0_i32_0 : i32, i32
  }
}

</mosaic_0001>

<bundles_post_ra>
// kernel: tpu_custom_call.1
= control target key start
LH: loop header
LB: loop body
LE: loop exit
PB: predicated region body
PF: predicated region fallthrough
CT: control target
= control target key end

     0   :  { %14 = vsyncpa [#allocation4], 0  ;;  %s3834_s0 = inlined_call_operand.vmem [shape: f32[64,16], index: 0, kind: input, shape index: {}]   ;;  %s3835_s1 = inlined_call_operand.vmem [shape: f32[16,384], index: 1, kind: input, shape index: {}]   ;;  %s3836_s2 = inlined_call_operand.hbm [shape: f32[128,384], index: 2, kind: input, shape index: {}]   ;;  %s3837_s3 = inlined_call_operand.vmem [shape: f32[1,384], index: 3, kind: input, shape index: {}]   ;;  %s3838_s4 = inlined_call_operand.vmem [shape: f32[1,128], index: 4, kind: input, shape index: {}]   ;;  %s3839_s5 = inlined_call_operand.vmem [shape: f32[8,128], index: 5, kind: input, shape index: {}]   ;;  %s3840_s6 = inlined_call_operand.hbm [shape: f32[128,128], index: 6, kind: input, shape index: {}]   ;;  %s3841_s7 = inlined_call_operand.hbm [shape: f32[128,128], index: 7, kind: input, shape index: {}]   ;;  %s3842_s8 = inlined_call_operand.vmem [shape: f32[1,128], index: 8, kind: input, shape index: {}]   ;;  %s3843_s9 = inlined_call_operand.hbm [shape: f32[8,128], index: 9, kind: output, shape index: {}]  }
   0x1   :  { %15 = vsyncpa [#allocation7], 0 }
   0x2   :  { %16 = vsyncpa [#allocation5], 0  ;;  %s2789_s30 = smov [#allocation6]  }
   0x3   :  { %s44_s10 = sshll.u32 %s2789_s30, 4  ;;  %s45_s10 = int_to_ptr.vmem [resolvable:$true] %s44_s10 }
   0x4   :  { %s2711_s11 = scalar_lea.vmem %s45_s10, 2048  ;;  %p2716_p1 = scmp.lt.s32.totalorder %s45_s10, %s45_s10 }
   0x5   :  { %p2712_p0 = scmp.ne.s32.totalorder %s45_s10, %s2711_s11  ;;  %p2717_p2 = scmp.lt.s32.totalorder %s2711_s11, %s2711_s11 }
   0x7   :  { %p2718_p3 = por %p2717_p2, %p2716_p1 }
   0x9   :  { %p2719_p4 = pnand %p2718_p3, %p2712_p0 }
   0xb   :  { %2722 = shalt.err (!%p2719_p4)
}
   0xc   :  { %s2790_s12 = smov 128   ;;  %s2791_s13 = smov 8  }
   0xd   :  { %50 = dma.hbm_to_vmem [thread:$0]  %s3840_s6, 2048, %s45_s10, [#allocation7], %s2790_s12, %s2790_s12, %s2791_s13  }
   0xe   :  { %s2792_s16 = smov [#allocation3]  }
   0xf   :  { %s26_s17 = sshll.u32 %s2792_s16, 4  ;;  %s27_s17 = int_to_ptr.vmem [resolvable:$true] %s26_s17 }
  0x10   :  { %s2731_s18 = scalar_lea.vmem %s27_s17, 6144  ;;  %p2736_p6 = scmp.lt.s32.totalorder %s27_s17, %s27_s17 }
  0x11   :  { %p2732_p5 = scmp.ne.s32.totalorder %s27_s17, %s2731_s18  ;;  %p2737_p7 = scmp.lt.s32.totalorder %s2731_s18, %s2731_s18 }
  0x13   :  { %p2738_p8 = por %p2737_p7, %p2736_p6 }
  0x15   :  { %p2739_p9 = pnand %p2738_p8, %p2732_p5 }
  0x17   :  { %2742 = shalt.err (!%p2739_p9)
}
  0x18   :  { %s2793_s19 = smov 384   ;;  %s2794_s20 = smov 24  }
  0x19   :  { %32 = dma.hbm_to_vmem [thread:$0]  %s3836_s2, 6144, %s27_s17, [#allocation4], %s2793_s19, %s2793_s19, %s2794_s20  }
  0x1a   :  { %s2795_s23 = smov [#allocation8]  }
  0x1b   :  { %s56_s24 = sshll.u32 %s2795_s23, 4  ;;  %s57_s24 = int_to_ptr.vmem [resolvable:$true] %s56_s24 }
  0x1c   :  { %s2751_s6 = scalar_lea.vmem %s57_s24, 2048  ;;  %p2756_p11 = scmp.lt.s32.totalorder %s57_s24, %s57_s24 }
  0x1d   :  { %p2752_p10 = scmp.ne.s32.totalorder %s57_s24, %s2751_s6  ;;  %p2757_p12 = scmp.lt.s32.totalorder %s2751_s6, %s2751_s6 }
  0x1f   :  { %p2758_p13 = por %p2757_p12, %p2756_p11 }
  0x21   :  { %p2759_p0 = pnand %p2758_p13, %p2752_p10 }
  0x23   :  { %2762 = shalt.err (!%p2759_p0)
}
  0x24   :  { %62 = dma.hbm_to_vmem [thread:$0]  %s3841_s7, 2048, %s57_s24, [#allocation7], %s2790_s12, %s2790_s12, %s2791_s13  }
  0x25   :  { %2783 = dma.done.wait [#allocation4], 6144  }
  0x26   :  { %2784 = vsyncadd [#allocation4], 4294961152 }
  0x27   :  { %2785 = dma.done.wait [#allocation7], 4096  }
  0x28   :  { %2786 = vsyncadd [#allocation7], 4294963200  ;;  %v3844_v0 = vmov 0.0   ;;  %v86_v1 = vld [vmem:[%s3835_s1 + $0x20] sm:$0xff]  ;;  %v85_v2 = vld [vmem:[%s3835_s1 + $0x18] sm:$0xff]  ;;  %vm105_vm0 = vcmask 130048   ;;  %v90_v63 = vlaneseq }
  0x29   :  { %194 = vmatprep.mubr.f32.mxu0 %v3844_v0  ;;  %v83_v3 = vld [vmem:[%s3835_s1 + $0x8] sm:$0xff]  ;;  %158 = vmatprep.subr.mxu0 %v86_v1  ;;  %v82_v4 = vld [vmem:[%s3835_s1] sm:$0xff]  ;;  %v2874_v6 = vld [vmem:[#allocation3 + $0x170] sm:$0xff]  ;;  %vm2797_vm1 = vmmov 0   ;;  %s2798_s13 = smov [#allocation9]  }
  0x2a   :  { %v74_v5 = vld [vmem:[%s3834_s0] sm:$0xff]  ;;  %159 = vmatpush1.msra.mxu0 %v85_v2  ;;  %3860 = vst [vmem:[#allocation13_spill] sm:$0xff] %v2874_v6  ;;  %v2877_v7 = vld [vmem:[#allocation3 + $0x168] sm:$0xff]  ;;  %v2879_v8 = vld [vmem:[#allocation3 + $0x158] sm:$0xff]  ;;  %v91_v1 = vshrl.u32 %v90_v63, 7  ;;  %s1967_s14 = sshll.u32 %s2798_s13, 4  ;;  %s1968_s14 = int_to_ptr.vmem [resolvable:$true] %s1967_s14 }
  0x2b   :  { %2202 = vmatprep.mubr.msk.f32.mxu1 %vm105_vm0, %v74_v5  ;;  %160 = vmatprep.subr.mxu0 %v83_v3  ;;  %v2883_v9 = vld [vmem:[#allocation3 + $0x150] sm:$0xff]  ;;  %v75_v10 = vld [vmem:[%s3834_s0 + $0x8] sm:$0xff]  ;;  %v2890_v11 = vld [vmem:[#allocation3 + $0x140] sm:$0xff]  ;;  %s2763_s15 = scalar_lea.vmem %s1968_s14, 128  ;;  %p2768_p2 = scmp.lt.s32.totalorder %s1968_s14, %s1968_s14 }
  0x2c   :  { %161 = vmatpush1.msra.mxu0 %v82_v4  ;;  %v2893_v12 = vld [vmem:[#allocation3 + $0x138] sm:$0xff]  ;;  %v2896_v13 = vld [vmem:[#allocation3 + $0x128] sm:$0xff]  ;;  %v2900_v14 = vld [vmem:[#allocation3 + $0x120] sm:$0xff]  ;;  %v92_v2 = vsub.s32 0, %v91_v1  ;;  %p2764_p1 = scmp.ne.s32.totalorder %s1968_s14, %s2763_s15  ;;  %p2769_p3 = scmp.lt.s32.totalorder %s2763_s15, %s2763_s15 }
  0x2d   :  { %1984 = vmatmul.mubr.msk.f32.vlgmr.msra.gmra.mxu0 %vm105_vm0, %v74_v5  ;;  %433 = vmatprep.subr.mxu0 %v2874_v6  ;;  %v2907_v15 = vld [vmem:[%s3834_s0 + $0x10] sm:$0xff]  ;;  %v2912_v17 = vld [vmem:[#allocation3 + $0x108] sm:$0xff]  ;;  %v2915_v18 = vld [vmem:[#allocation3 + $0xf8] sm:$0xff]  ;;  %v96_v5 = vsub.s32 1, %v91_v1 }
  0x2e   :  { %434 = vmatpush1.msra.mxu0 %v2877_v7  ;;  %200 = vmatprep.mubr.f32.mxu0 %v3844_v0  ;;  %v2909_v16 = vld [vmem:[#allocation3 + $0x110] sm:$0xff]  ;;  %v87_v19 = vld [vmem:[%s3835_s1 + $0x28] sm:$0xff]  ;;  %v2930_v21 = vld [vmem:[%s3834_s0 + $0x18] sm:$0xff]  ;;  %p2770_p4 = por %p2769_p3, %p2768_p2 }
  0x2f   :  { %435 = vmatprep.subr.mxu0 %v2879_v8  ;;  %v2923_v20 = vld [vmem:[#allocation3 + $0xf0] sm:$0xff]  ;;  %v2932_v22 = vld [vmem:[#allocation3 + $0xe0] sm:$0xff]  ;;  %v2935_v23 = vld [vmem:[#allocation3 + $0xd8] sm:$0xff]  ;;  %2198 = vmatprep.subr.mxu1 %v87_v19 }
  0x30   :  { %436 = vmatpush1.msra.mxu0 %v2883_v9  ;;  %v2938_v24 = vld [vmem:[#allocation3 + $0xc8] sm:$0xff]  ;;  %2199 = vmatpush3.msra.mxu1 %v87_v19  ;;  %v84_v25 = vld [vmem:[%s3835_s1 + $0x10] sm:$0xff]  ;;  %v2946_v26 = vld [vmem:[#allocation3 + $0xc0] sm:$0xff]  ;;  %p2771_p5 = pnand %p2770_p4, %p2764_p1 }
  0x31   :  { %1985 = vmatmul.mubr.msk.f32.gmra.mxu0 %vm105_vm0, %v75_v10  ;;  %437 = vmatprep.subr.mxu0 %v2890_v11  ;;  %v2953_v27 = vld [vmem:[%s3834_s0 + $0x20] sm:$0xff]  ;;  %v2955_v28 = vld [vmem:[#allocation3 + $0xb0] sm:$0xff]  ;;  %v2958_v29 = vld [vmem:[#allocation3 + $0xa8] sm:$0xff] }
  0x32   :  { %438 = vmatpush1.msra.mxu0 %v2893_v12  ;;  %206 = vmatprep.mubr.f32.mxu0 %v3844_v0  ;;  %v2961_v30 = vld [vmem:[#allocation3 + $0x98] sm:$0xff]  ;;  %v2966_v31 = vld [vmem:[#allocation3 + $0x90] sm:$0xff]  ;;  %v2973_v32 = vld [vmem:[%s3834_s0 + $0x28] sm:$0xff] }
  0x33   :  { %439 = vmatprep.subr.mxu0 %v2896_v13  ;;  %2200 = vmatprep.subr.mxu1 %v84_v25  ;;  %v2975_v33 = vld [vmem:[#allocation3 + $0x80] sm:$0xff]  ;;  %v2978_v34 = vld [vmem:[#allocation3 + $0x78] sm:$0xff]  ;;  %v2982_v35 = vld [vmem:[#allocation3 + $0x68] sm:$0xff] }
  0x34   :  { %440 = vmatpush1.msra.mxu0 %v2900_v14  ;;  %2201 = vmatpush3.msra.mxu1 %v84_v25  ;;  %v2985_v36 = vld [vmem:[#allocation3 + $0x178] sm:$0xff]  ;;  %v2990_v37 = vld [vmem:[#allocation3 + $0x60] sm:$0xff]  ;;  %v80_v38 = vld [vmem:[%s3834_s0 + $0x30] sm:$0xff] }
  0x35   :  { %1986 = vmatmul.mubr.msk.f32.gmra.mxu0 %vm105_vm0, %v2907_v15  ;;  %441 = vmatprep.subr.mxu0 %v2909_v16  ;;  %v2997_v39 = vld [vmem:[#allocation3 + $0x50] sm:$0xff]  ;;  %v3000_v40 = vld [vmem:[#allocation3 + $0x48] sm:$0xff]  ;;  %v3004_v41 = vld [vmem:[#allocation3 + $0x38] sm:$0xff] }
  0x36   :  { %442 = vmatpush1.msra.mxu0 %v2912_v17  ;;  %212 = vmatprep.mubr.f32.mxu0 %v3844_v0  ;;  %v3007_v42 = vld [vmem:[#allocation3 + $0x160] sm:$0xff]  ;;  %v3011_v43 = vld [vmem:[#allocation3 + $0x30] sm:$0xff]  ;;  %v81_v44 = vld [vmem:[%s3834_s0 + $0x38] sm:$0xff] }
  0x37   :  { %443 = vmatprep.subr.mxu0 %v2915_v18  ;;  %2214 = vmatprep.subr.mxu1 %v3844_v0  ;;  %v3018_v45 = vld [vmem:[#allocation3 + $0x20] sm:$0xff]  ;;  %v3021_v46 = vld [vmem:[#allocation3 + $0x18] sm:$0xff]  ;;  %v3025_v47 = vld [vmem:[#allocation3 + $0x8] sm:$0xff] }
  0x38   :  { %444 = vmatpush1.msra.mxu0 %v2923_v20  ;;  %2203 = vmatmul.mubr.msk.f32.vlgmr.msra.gmra.mxu1 %vm105_vm0, %v75_v10  ;;  %3861 = vst [vmem:[#allocation14_spill] sm:$0xff] %v3025_v47  ;;  %v3028_v48 = vld [vmem:[#allocation3 + $0x148] sm:$0xff]  ;;  %v3032_v49 = vld [vmem:[#allocation3] sm:$0xff]  ;;  %v3036_v50 = vld [vmem:[#allocation3 + $0x130] sm:$0xff] }
  0x39   :  { %1987 = vmatmul.mubr.msk.f32.gmra.mxu0 %vm105_vm0, %v2930_v21  ;;  %445 = vmatprep.subr.mxu0 %v2932_v22  ;;  %3862 = vst [vmem:[#allocation15_spill] sm:$0xff] %v3032_v49  ;;  %v3042_v51 = vld [vmem:[#allocation3 + $0x118] sm:$0xff]  ;;  %v3047_v52 = vld [vmem:[#allocation3 + $0x100] sm:$0xff]  ;;  %v3054_v53 = vld [vmem:[#allocation3 + $0xe8] sm:$0xff] }
  0x3a   :  { %446 = vmatpush1.msra.mxu0 %v2935_v23  ;;  %218 = vmatprep.mubr.f32.mxu0 %v3844_v0  ;;  %v3062_v54 = vld [vmem:[#allocation3 + $0xd0] sm:$0xff]  ;;  %v3068_v55 = vld [vmem:[#allocation3 + $0xb8] sm:$0xff]  ;;  %v3075_v56 = vld [vmem:[#allocation3 + $0xa0] sm:$0xff] }
  0x3b   :  { %447 = vmatprep.subr.mxu0 %v2938_v24  ;;  %2215 = vmatpush3.msra.mxu1 %v2985_v36  ;;  %v3081_v57 = vld [vmem:[#allocation3 + $0x88] sm:$0xff]  ;;  %v3088_v58 = vld [vmem:[#allocation3 + $0x70] sm:$0xff]  ;;  %v3094_v59 = vld [vmem:[#allocation3 + $0x58] sm:$0xff] }
  0x3c   :  { %448 = vmatpush1.msra.mxu0 %v2946_v26  ;;  %2216 = vmatprep.subr.mxu1 %v3844_v0  ;;  %v3100_v60 = vld [vmem:[#allocation3 + $0x40] sm:$0xff]  ;;  %v3106_v61 = vld [vmem:[#allocation3 + $0x28] sm:$0xff]  ;;  %v3112_v62 = vld [vmem:[#allocation3 + $0x10] sm:$0xff] }
  0x3d   :  { %1988 = vmatmul.mubr.msk.f32.gmra.mxu0 %vm105_vm0, %v2953_v27  ;;  %449 = vmatprep.subr.mxu0 %v2955_v28  ;;  %3863 = vst [vmem:[#allocation16_spill] sm:$0xff] %v3106_v61  ;;  %3864 = vst [vmem:[#allocation17_spill] sm:$0xff] %v3112_v62  ;;  %v88_v3 = vld [vmem:[%s3837_s3] sm:$0x7] }
  0x3e   :  { %450 = vmatpush1.msra.mxu0 %v2958_v29  ;;  %224 = vmatprep.mubr.f32.mxu0 %v3844_v0 }
  0x3f   :  { %451 = vmatprep.subr.mxu0 %v2961_v30  ;;  %2217 = vmatpush3.msra.mxu1 %v3007_v42 }
  0x40   :  { %452 = vmatpush1.msra.mxu0 %v2966_v31  ;;  %2218 = vmatprep.subr.mxu1 %v3844_v0 }
  0x41   :  { %1989 = vmatmul.mubr.msk.f32.gmra.mxu0 %vm105_vm0, %v2973_v32  ;;  %453 = vmatprep.subr.mxu0 %v2975_v33 }
  0x42   :  { %454 = vmatpush1.msra.mxu0 %v2978_v34  ;;  %230 = vmatprep.mubr.f32.mxu0 %v3844_v0 }
  0x43   :  { %455 = vmatprep.subr.mxu0 %v2982_v35  ;;  %2219 = vmatpush3.msra.mxu1 %v3028_v48 }
  0x44   :  { %456 = vmatpush1.msra.mxu0 %v2990_v37  ;;  %2220 = vmatprep.subr.mxu1 %v3844_v0 }
  0x45   :  { %1990 = vmatmul.mubr.msk.f32.gmra.mxu0 %vm105_vm0, %v80_v38  ;;  %457 = vmatprep.subr.mxu0 %v2997_v39 }
  0x46   :  { %458 = vmatpush1.msra.mxu0 %v3000_v40  ;;  %236 = vmatprep.mubr.f32.mxu0 %v3844_v0 }
  0x47   :  { %459 = vmatprep.subr.mxu0 %v3004_v41  ;;  %2221 = vmatpush3.msra.mxu1 %v3036_v50 }
  0x48   :  { %460 = vmatpush1.msra.mxu0 %v3011_v43  ;;  %2222 = vmatprep.subr.mxu1 %v3844_v0 }
  0x49   :  { %1991 = vmatmul.mubr.msk.f32.gmra.mxu0 %vm105_vm0, %v81_v44  ;;  %461 = vmatprep.subr.mxu0 %v3018_v45 }
  0x4a   :  { %462 = vmatpush1.msra.mxu0 %v3021_v46  ;;  %497 = vmatprep.mubr.f32.mxu0 %v3844_v0 }
  0x4b   :  { %463 = vmatprep.subr.mxu0 %v3025_v47  ;;  %2205 = vmatprep.mubr.msk.f32.mxu1 %vm105_vm0, %v2907_v15  ;;  %v93_v15 = vrot.slane %v88_v3, %v92_v2 }
  0x4c   :  { %464 = vmatpush1.msra.mxu0 %v3032_v49  ;;  %2223 = vmatpush3.msra.mxu1 %v3042_v51 }
  0x4d   :  { %498 = vmatmul.mubr.f32.vlgmr.msra.gmra.mxu0 %v3844_v0  ;;  %602 = vmatprep.subr.mxu0 %v2874_v6 }
  0x4e   :  { %2224 = vmatprep.subr.mxu1 %v3844_v0  ;;  %2206 = vmatmul.mubr.msk.f32.gmra.mxu1 %vm105_vm0, %v2930_v21  ;;  %v97_v21 = vrot.slane %v88_v3, %v96_v5 }
  0x4f   :  { %2225 = vmatpush3.msra.mxu1 %v3047_v52  ;;  %2208 = vmatprep.mubr.msk.f32.mxu1 %vm105_vm0, %v2953_v27 }
  0x50   :  { %2226 = vmatprep.subr.mxu1 %v3844_v0  ;;  %603 = vmatpush1.msra.mxu0 %v2877_v7 }
  0x51   :  { %2227 = vmatpush3.msra.mxu1 %v3054_v53  ;;  %604 = vmatprep.subr.mxu0 %v2879_v8 }
  0x52   :  { %2228 = vmatprep.subr.mxu1 %v3844_v0  ;;  %2209 = vmatmul.mubr.msk.f32.gmra.mxu1 %vm105_vm0, %v2973_v32 }
  0x53   :  { %2229 = vmatpush3.msra.mxu1 %v3062_v54  ;;  %2211 = vmatprep.mubr.msk.f32.mxu1 %vm105_vm0, %v80_v38 }
  0x54   :  { %2230 = vmatprep.subr.mxu1 %v3844_v0  ;;  %605 = vmatpush1.msra.mxu0 %v2883_v9 }
  0x55   :  { %2231 = vmatpush3.msra.mxu1 %v3068_v55  ;;  %606 = vmatprep.subr.mxu0 %v2890_v11 }
  0x56   :  { %2232 = vmatprep.subr.mxu1 %v3844_v0  ;;  %2212 = vmatmul.mubr.msk.f32.gmra.mxu1 %vm105_vm0, %v81_v44 }
  0x57   :  { %2233 = vmatpush3.msra.mxu1 %v3075_v56  ;;  %2246 = vmatprep.mubr.msk.f32.mxu1 %vm2797_vm1, %v3844_v0 }
  0x58   :  { %2234 = vmatprep.subr.mxu1 %v3844_v0  ;;  %607 = vmatpush1.msra.mxu0 %v2893_v12 }
  0x59   :  { %2235 = vmatpush3.msra.mxu1 %v3081_v57  ;;  %608 = vmatprep.subr.mxu0 %v2896_v13 }
  0x5a   :  { %2236 = vmatprep.subr.mxu1 %v3844_v0  ;;  %609 = vmatpush1.msra.mxu0 %v2900_v14 }
  0x5b   :  { %2237 = vmatpush3.msra.mxu1 %v3088_v58  ;;  %610 = vmatprep.subr.mxu0 %v2909_v16 }
  0x5c   :  { %2238 = vmatprep.subr.mxu1 %v3844_v0  ;;  %611 = vmatpush1.msra.mxu0 %v2912_v17 }
  0x5d   :  { %2239 = vmatpush3.msra.mxu1 %v3094_v59  ;;  %612 = vmatprep.subr.mxu0 %v2915_v18 }
  0x5e   :  { %2240 = vmatprep.subr.mxu1 %v3844_v0  ;;  %613 = vmatpush1.msra.mxu0 %v2923_v20 }
  0x5f   :  { %2241 = vmatpush3.msra.mxu1 %v3100_v60  ;;  %614 = vmatprep.subr.mxu0 %v2932_v22 }
  0x60   :  { %2242 = vmatprep.subr.mxu1 %v3844_v0  ;;  %615 = vmatpush1.msra.mxu0 %v2935_v23 }
  0x61   :  { %2243 = vmatpush3.msra.mxu1 %v3106_v61  ;;  %616 = vmatprep.subr.mxu0 %v2938_v24 }
  0x62   :  { %2244 = vmatprep.subr.mxu1 %v3844_v0  ;;  %617 = vmatpush1.msra.mxu0 %v2946_v26 }
  0x63   :  { %2245 = vmatpush3.msra.mxu1 %v3112_v62  ;;  %618 = vmatprep.subr.mxu0 %v2955_v28 }
  0x64   :  { %2247 = vmatmul.mubr.f32.vlgmr.msra.gmra.mxu1 %v3844_v0  ;;  %2249 = vmatprep.subr.mxu1 %v3844_v0 }
  0x65   :  { %2250 = vmatpush3.msra.mxu1 %v2985_v36  ;;  %619 = vmatpush1.msra.mxu0 %v2958_v29 }
  0x66   :  { %2251 = vmatprep.subr.mxu1 %v3844_v0  ;;  %620 = vmatprep.subr.mxu0 %v2961_v30 }
  0x67   :  { %2252 = vmatpush3.msra.mxu1 %v3007_v42  ;;  %621 = vmatpush1.msra.mxu0 %v2966_v31 }
  0x68   :  { %2253 = vmatprep.subr.mxu1 %v3844_v0  ;;  %622 = vmatprep.subr.mxu0 %v2975_v33 }
  0x69   :  { %2254 = vmatpush3.msra.mxu1 %v3028_v48  ;;  %623 = vmatpush1.msra.mxu0 %v2978_v34 }
  0x6a   :  { %2255 = vmatprep.subr.mxu1 %v3844_v0  ;;  %624 = vmatprep.subr.mxu0 %v2982_v35 }
  0x6b   :  { %2256 = vmatpush3.msra.mxu1 %v3036_v50  ;;  %625 = vmatpush1.msra.mxu0 %v2990_v37 }
  0x6c   :  { %2257 = vmatprep.subr.mxu1 %v3844_v0  ;;  %626 = vmatprep.subr.mxu0 %v2997_v39 }
  0x6d   :  { %2258 = vmatpush3.msra.mxu1 %v3042_v51  ;;  %627 = vmatpush1.msra.mxu0 %v3000_v40 }
  0x6e   :  { %2259 = vmatprep.subr.mxu1 %v3844_v0  ;;  %628 = vmatprep.subr.mxu0 %v3004_v41 }
  0x6f   :  { %2260 = vmatpush3.msra.mxu1 %v3047_v52  ;;  %629 = vmatpush1.msra.mxu0 %v3011_v43 }
  0x70   :  { %2261 = vmatprep.subr.mxu1 %v3844_v0  ;;  %630 = vmatprep.subr.mxu0 %v3018_v45 }
  0x71   :  { %2262 = vmatpush3.msra.mxu1 %v3054_v53  ;;  %631 = vmatpush1.msra.mxu0 %v3021_v46 }
  0x72   :  { %2263 = vmatprep.subr.mxu1 %v3844_v0  ;;  %632 = vmatprep.subr.mxu0 %v3025_v47 }
  0x73   :  { %2264 = vmatpush3.msra.mxu1 %v3062_v54  ;;  %633 = vmatpush1.msra.mxu0 %v3032_v49 }
  0x74   :  { %2265 = vmatprep.subr.mxu1 %v3844_v0  ;;  %666 = vmatprep.mubr.f32.mxu0 %v3844_v0 }
  0x75   :  { %2266 = vmatpush3.msra.mxu1 %v3068_v55  ;;  %2281 = vmatprep.mubr.msk.f32.mxu1 %vm2797_vm1, %v3844_v0 }
  0x76   :  { %2267 = vmatprep.subr.mxu1 %v3844_v0  ;;  %771 = vmatprep.subr.mxu0 %v2874_v6 }
  0x77   :  { %2268 = vmatpush3.msra.mxu1 %v3075_v56 }
  0x78   :  { %2269 = vmatprep.subr.mxu1 %v3844_v0 }
  0x79   :  { %2270 = vmatpush3.msra.mxu1 %v3081_v57 }
  0x7a   :  { %2271 = vmatprep.subr.mxu1 %v3844_v0 }
  0x7b   :  { %2272 = vmatpush3.msra.mxu1 %v3088_v58 }
  0x7c   :  { %2273 = vmatprep.subr.mxu1 %v3844_v0 }
  0x7d   :  { %2274 = vmatpush3.msra.mxu1 %v3094_v59 }
  0x7e   :  { %2275 = vmatprep.subr.mxu1 %v3844_v0 }
  0x7f   :  { %2276 = vmatpush3.msra.mxu1 %v3100_v60 }
  0x80   :  { %2277 = vmatprep.subr.mxu1 %v3844_v0 }
  0x81   :  { %2278 = vmatpush3.msra.mxu1 %v3106_v61 }
  0x82   :  { %2279 = vmatprep.subr.mxu1 %v3844_v0 }
  0x83   :  { %2280 = vmatpush3.msra.mxu1 %v3112_v62  ;;  %v100_v62 = vsub.s32 2, %v91_v1 }
  0x84   :  { %2284 = vmatprep.subr.mxu1 %v3844_v0 }
  0x85   :  { %v101_v5 = vrot.slane %v88_v3, %v100_v62 }
  0xed   :  { %v196_v4 = vpop.f32.mrf.mxu0 }
  0xef   :  { %v198_v10 = vpop.f32.mrf.mxu0 }
  0xf1   :  { %v202_v19 = vpop.f32.mrf.mxu0 }
  0xf2   :  { %v3177_v25 = vadd.f32 %v202_v19, %v93_v15 }
  0xf3   :  { %v204_v27 = vpop.f32.mrf.mxu0 }
  0xf4   :  { %3865 = vst [vmem:[#allocation18_spill] sm:$0xff] %v3177_v25  ;;  %v3179_v32 = vadd.f32 %v204_v27, %v97_v21 }
  0xf5   :  { %v208_v38 = vpop.f32.mrf.mxu0 }
  0xf6   :  { %3866 = vst [vmem:[#allocation19_spill] sm:$0xff] %v3179_v32  ;;  %v3181_v44 = vadd.f32 %v208_v38, %v93_v15 }
  0xf7   :  { %v210_v63 = vpop.f32.mrf.mxu0 }
  0xf8   :  { %3867 = vst [vmem:[#allocation20_spill] sm:$0xff] %v3181_v44  ;;  %v3183_v0 = vadd.f32 %v210_v63, %v97_v21  ;;  %v2204_v32 = vpop.f32.mrf.mxu1 }
  0xf9   :  { %v214_v6 = vpop.f32.mrf.mxu0  ;;  %v3193_v44 = vadd.f32 %v2204_v32, %v101_v5 }
  0xfa   :  { %3868 = vst [vmem:[#allocation21_spill] sm:$0xff] %v3183_v0  ;;  %v3185_v49 = vadd.f32 %v214_v6, %v93_v15 }
  0xfb   :  { %v216_v47 = vpop.f32.mrf.mxu0  ;;  %3873 = vst [vmem:[#allocation26_spill] sm:$0xff] %v3193_v44 }
  0xfc   :  { %3869 = vst [vmem:[#allocation22_spill] sm:$0xff] %v3185_v49  ;;  %v3187_v61 = vadd.f32 %v216_v47, %v97_v21 }
  0xfd   :  { %v220_v2 = vpop.f32.mrf.mxu0 }
  0xfe   :  { %3870 = vst [vmem:[#allocation23_spill] sm:$0xff] %v3187_v61  ;;  %v3189_v19 = vadd.f32 %v220_v2, %v93_v15  ;;  %v197_v2 = vadd.f32 %v196_v4, %v93_v15 }
  0xff   :  { %v222_v25 = vpop.f32.mrf.mxu0 }
 0x100   :  { %3871 = vst [vmem:[#allocation24_spill] sm:$0xff] %v3189_v19  ;;  %v3191_v27 = vadd.f32 %v222_v25, %v97_v21 }
 0x101   :  { %v226_v38 = vpop.f32.mrf.mxu0 }
 0x102   :  { %3872 = vst [vmem:[#allocation25_spill] sm:$0xff] %v3191_v27  ;;  %v3195_v63 = vadd.f32 %v226_v38, %v93_v15  ;;  %v309_v38 = vpop.f32.mrf.mxu1 }
 0x103   :  { %v228_v0 = vpop.f32.mrf.mxu0 }
 0x104   :  { %3874 = vst [vmem:[#allocation27_spill] sm:$0xff] %v3195_v63  ;;  %v3197_v1 = vadd.f32 %v228_v0, %v97_v21 }
 0x105   :  { %v232_v6 = vpop.f32.mrf.mxu0 }
 0x106   :  { %3875 = vst [vmem:[#allocation28_spill] sm:$0xff] %v3197_v1  ;;  %v3199_v49 = vadd.f32 %v232_v6, %v93_v15  ;;  %v199_v6 = vadd.f32 %v198_v10, %v97_v21 }
 0x107   :  { %v234_v47 = vpop.f32.mrf.mxu0 }
 0x108   :  { %3876 = vst [vmem:[#allocation29_spill] sm:$0xff] %v3199_v49  ;;  %v3201_v61 = vadd.f32 %v234_v47, %v97_v21 }
 0x109   :  { %v238_v62 = vpop.f32.mrf.mxu0 }
 0x10a   :  { %3877 = vst [vmem:[#allocation30_spill] sm:$0xff] %v3201_v61  ;;  %v3203_v3 = vadd.f32 %v238_v62, %v93_v15 }
 0x10b   :  { %v240_v25 = vpop.f32.mrf.mxu0 }
 0x10c   :  { %3878 = vst [vmem:[#allocation31_spill] sm:$0xff] %v3203_v3  ;;  %v3205_v27 = vadd.f32 %v240_v25, %v97_v21 }
 0x10d   :  { %v499_v32 = vpop.f32.mrf.mxu0 }
 0x10e   :  { %3879 = vst [vmem:[#allocation32_spill] sm:$0xff] %v3205_v27  ;;  %v574_v19 = vadd.f32 %v499_v32, %v197_v2  ;;  %v2207_v44 = vpop.f32.mrf.mxu1 }
 0x10f   :  { %v501_v0 = vpop.f32.mrf.mxu0  ;;  %v3207_v1 = vadd.f32 %v2207_v44, %v101_v5 }
 0x110   :  { %v2001_v63 = vmul.f32 -1.442695, %v574_v19  ;;  %v319_v49 = vpop.f32.mrf.mxu1  ;;  %v581_v61 = vadd.f32 %v501_v0, %v199_v6  ;;  %v3222_v0 = vld [vmem:[%s3838_s4] ss:$0 sm:$0xff] }
 0x111   :  { %3880 = vst [vmem:[#allocation33_spill] sm:$0xff] %v3207_v1  ;;  %v3209_v47 = vadd.f32 %v319_v49, %v101_v5 }
 0x112   :  { %2574 = vpow2.f32 %v2001_v63  ;;  %v2210_v62 = vpop.f32.mrf.mxu1  ;;  %v2002_v25 = vmul.f32 -1.442695, %v581_v61 }
 0x113   :  { %3881 = vst [vmem:[#allocation34_spill] sm:$0xff] %v3209_v47  ;;  %v3211_v3 = vadd.f32 %v2210_v62, %v101_v5 }
 0x114   :  { %v329_v4 = vpop.f32.mrf.mxu1  ;;  %2576 = vpow2.f32 %v2002_v25 }
 0x115   :  { %3882 = vst [vmem:[#allocation35_spill] sm:$0xff] %v3211_v3  ;;  %v3213_v15 = vadd.f32 %v329_v4, %v101_v5  ;;  %v310_v4 = vadd.f32 %v309_v38, %v101_v5  ;;  %v3887_v38 = vld [vmem:[#allocation16_spill] sm:$0xff] }
 0x116   :  { %v2213_v2 = vpop.f32.mrf.mxu1 }
 0x117   :  { %3883 = vst [vmem:[#allocation36_spill] sm:$0xff] %v3213_v15  ;;  %v3215_v32 = vadd.f32 %v2213_v2, %v101_v5 }
 0x118   :  { %v339_v19 = vpop.f32.mrf.mxu1 }
 0x119   :  { %3884 = vst [vmem:[#allocation37_spill] sm:$0xff] %v3215_v32  ;;  %v3217_v27 = vadd.f32 %v339_v19, %v101_v5  ;;  %v3886_v5 = vmov 0.0  }
 0x11b   :  { %3885 = vst [vmem:[#allocation38_spill] sm:$0xff] %v3217_v27 }
 0x11f   :  { %v2575_v10 = vpop.eup %2574 }
 0x120   :  { %v578_v21 = vadd.f32 1.0, %v2575_v10 }
 0x121   :  { %v2577_v63 = vpop.eup %2576 }
 0x122   :  { %2578 = vrcp.f32 %v578_v21  ;;  %v585_v6 = vadd.f32 1.0, %v2577_v63  ;;  %v3890_v63 = vld [vmem:[#allocation17_spill] sm:$0xff] }
 0x124   :  { %v570_v49 = vpop.f32.mrf.mxu1  ;;  %2580 = vrcp.f32 %v585_v6  ;;  %v3891_v6 = vld [vmem:[#allocation13_spill] sm:$0xff] }
 0x125   :  { %v588_v61 = vadd.f32 %v3222_v0, %v570_v49  ;;  %v3889_v49 = vld [vmem:[#allocation15_spill] sm:$0xff] }
 0x126   :  { %v2248_v44 = vpop.f32.mrf.mxu1 }
 0x12f   :  { %v2579_v62 = vpop.eup %2578 }
 0x130   :  { %v589_v2 = vmul.f32 %v2579_v62, %v588_v61 }
 0x131   :  { %v2581_v25 = vpop.eup %2580 }
 0x132   :  { %v590_v19 = vadd.f32 %v589_v2, %v310_v4  ;;  %v592_v10 = vsub.f32 1.0, %v2581_v25  ;;  %v594_v44 = vmul.f32 0.0, %v2581_v25  ;;  %v3892_v4 = vld [vmem:[#allocation18_spill] sm:$0xff] }
 0x134   :  { %2582 = vtanh.f32 %v590_v19 }
 0x141   :  { %v2583_v21 = vpop.eup %2582 }
 0x142   :  { %v593_v32 = vmul.f32 %v2583_v21, %v592_v10  ;;  %v3893_v21 = vld [vmem:[#allocation19_spill] sm:$0xff] }
 0x144   :  { %v3225_v27 = vadd.f32 %v594_v44, %v593_v32  ;;  %v3888_v32 = vld [vmem:[#allocation14_spill] sm:$0xff] }
 0x146   :  { %667 = vmatmul.mubr.f32.vlgmr.msra.gmra.mxu0 %v3225_v27  ;;  %2282 = vmatmul.mubr.f32.vlgmr.msra.gmra.mxu1 %v3225_v27 }
 0x147   :  { %772 = vmatpush1.msra.mxu0 %v2877_v7  ;;  %2285 = vmatpush3.msra.mxu1 %v2985_v36 }
 0x148   :  { %773 = vmatprep.subr.mxu0 %v2879_v8  ;;  %2286 = vmatprep.subr.mxu1 %v3886_v5 }
 0x149   :  { %774 = vmatpush1.msra.mxu0 %v2883_v9  ;;  %2287 = vmatpush3.msra.mxu1 %v3007_v42 }
 0x14a   :  { %775 = vmatprep.subr.mxu0 %v2890_v11  ;;  %2288 = vmatprep.subr.mxu1 %v3886_v5 }
 0x14b   :  { %776 = vmatpush1.msra.mxu0 %v2893_v12  ;;  %2289 = vmatpush3.msra.mxu1 %v3028_v48 }
 0x14c   :  { %777 = vmatprep.subr.mxu0 %v2896_v13  ;;  %2290 = vmatprep.subr.mxu1 %v3886_v5 }
 0x14d   :  { %778 = vmatpush1.msra.mxu0 %v2900_v14  ;;  %2291 = vmatpush3.msra.mxu1 %v3036_v50 }
 0x14e   :  { %779 = vmatprep.subr.mxu0 %v2909_v16  ;;  %2292 = vmatprep.subr.mxu1 %v3886_v5 }
 0x14f   :  { %780 = vmatpush1.msra.mxu0 %v2912_v17  ;;  %2293 = vmatpush3.msra.mxu1 %v3042_v51 }
 0x150   :  { %781 = vmatprep.subr.mxu0 %v2915_v18  ;;  %2294 = vmatprep.subr.mxu1 %v3886_v5 }
 0x151   :  { %782 = vmatpush1.msra.mxu0 %v2923_v20  ;;  %2295 = vmatpush3.msra.mxu1 %v3047_v52 }
 0x152   :  { %783 = vmatprep.subr.mxu0 %v2932_v22  ;;  %2296 = vmatprep.subr.mxu1 %v3886_v5 }
 0x153   :  { %784 = vmatpush1.msra.mxu0 %v2935_v23  ;;  %2297 = vmatpush3.msra.mxu1 %v3054_v53 }
 0x154   :  { %785 = vmatprep.subr.mxu0 %v2938_v24  ;;  %2298 = vmatprep.subr.mxu1 %v3886_v5 }
 0x155   :  { %786 = vmatpush1.msra.mxu0 %v2946_v26  ;;  %2299 = vmatpush3.msra.mxu1 %v3062_v54 }
 0x156   :  { %787 = vmatprep.subr.mxu0 %v2955_v28  ;;  %2300 = vmatprep.subr.mxu1 %v3886_v5 }
 0x157   :  { %788 = vmatpush1.msra.mxu0 %v2958_v29  ;;  %2301 = vmatpush3.msra.mxu1 %v3068_v55 }
 0x158   :  { %789 = vmatprep.subr.mxu0 %v2961_v30  ;;  %2302 = vmatprep.subr.mxu1 %v3886_v5 }
 0x159   :  { %790 = vmatpush1.msra.mxu0 %v2966_v31  ;;  %2303 = vmatpush3.msra.mxu1 %v3075_v56 }
 0x15a   :  { %791 = vmatprep.subr.mxu0 %v2975_v33  ;;  %2304 = vmatprep.subr.mxu1 %v3886_v5 }
 0x15b   :  { %792 = vmatpush1.msra.mxu0 %v2978_v34  ;;  %2305 = vmatpush3.msra.mxu1 %v3081_v57 }
 0x15c   :  { %793 = vmatprep.subr.mxu0 %v2982_v35  ;;  %2306 = vmatprep.subr.mxu1 %v3886_v5 }
 0x15d   :  { %794 = vmatpush1.msra.mxu0 %v2990_v37  ;;  %2307 = vmatpush3.msra.mxu1 %v3088_v58 }
 0x15e   :  { %795 = vmatprep.subr.mxu0 %v2997_v39  ;;  %2308 = vmatprep.subr.mxu1 %v3886_v5 }
 0x15f   :  { %796 = vmatpush1.msra.mxu0 %v3000_v40  ;;  %2309 = vmatpush3.msra.mxu1 %v3094_v59 }
 0x160   :  { %797 = vmatprep.subr.mxu0 %v3004_v41  ;;  %2310 = vmatprep.subr.mxu1 %v3886_v5 }
 0x161   :  { %798 = vmatpush1.msra.mxu0 %v3011_v43  ;;  %2311 = vmatpush3.msra.mxu1 %v3100_v60 }
 0x162   :  { %799 = vmatprep.subr.mxu0 %v3018_v45  ;;  %2312 = vmatprep.subr.mxu1 %v3886_v5 }
 0x163   :  { %800 = vmatpush1.msra.mxu0 %v3021_v46  ;;  %2313 = vmatpush3.msra.mxu1 %v3887_v38  ;;  %v3894_v38 = vld [vmem:[#allocation26_spill] sm:$0xff] }
 0x164   :  { %801 = vmatprep.subr.mxu0 %v3888_v32  ;;  %2314 = vmatprep.subr.mxu1 %v3886_v5 }
 0x165   :  { %802 = vmatpush1.msra.mxu0 %v3889_v49  ;;  %835 = vmatprep.mubr.f32.mxu0 %v3886_v5 }
 0x166   :  { %2315 = vmatpush3.msra.mxu1 %v3890_v63  ;;  %2316 = vmatprep.mubr.msk.f32.mxu1 %vm2797_vm1, %v3886_v5 }
 0x167   :  { %940 = vmatprep.subr.mxu0 %v3891_v6  ;;  %2319 = vmatprep.subr.mxu1 %v3886_v5 }
 0x206   :  { %v668_v61 = vpop.f32.mrf.mxu0  ;;  %v739_v62 = vpop.f32.mrf.mxu1 }
 0x207   :  { %v743_v2 = vadd.f32 %v668_v61, %v3892_v4  ;;  %v757_v6 = vadd.f32 %v3222_v0, %v739_v62 }
 0x208   :  { %v2283_v19 = vpop.f32.mrf.mxu1  ;;  %v670_v10 = vpop.f32.mrf.mxu0 }
 0x209   :  { %v2003_v25 = vmul.f32 -1.442695, %v743_v2  ;;  %v750_v44 = vadd.f32 %v670_v10, %v3893_v21 }
 0x20b   :  { %2584 = vpow2.f32 %v2003_v25  ;;  %v2004_v3 = vmul.f32 -1.442695, %v750_v44 }
 0x20d   :  { %2586 = vpow2.f32 %v2004_v3 }
 0x218   :  { %v2585_v15 = vpop.eup %2584 }
 0x219   :  { %v747_v1 = vadd.f32 1.0, %v2585_v15  ;;  %v3898_v15 = vld [vmem:[#allocation17_spill] sm:$0xff] }
 0x21a   :  { %v2587_v47 = vpop.eup %2586 }
 0x21b   :  { %2588 = vrcp.f32 %v747_v1  ;;  %v754_v63 = vadd.f32 1.0, %v2587_v47  ;;  %v3896_v1 = vld [vmem:[#allocation14_spill] sm:$0xff]  ;;  %v3897_v47 = vld [vmem:[#allocation15_spill] sm:$0xff] }
 0x21d   :  { %2590 = vrcp.f32 %v754_v63  ;;  %v3900_v63 = vld [vmem:[#allocation20_spill] sm:$0xff] }
 0x228   :  { %v2589_v49 = vpop.eup %2588 }
 0x229   :  { %v758_v32 = vmul.f32 %v2589_v49, %v757_v6 }
 0x22a   :  { %v2591_v4 = vpop.eup %2590 }
 0x22b   :  { %v759_v61 = vadd.f32 %v758_v32, %v3894_v38  ;;  %v761_v2 = vsub.f32 1.0, %v2591_v4  ;;  %v763_v10 = vmul.f32 %v2591_v4, %v3225_v27  ;;  %v3895_v27 = vld [vmem:[#allocation16_spill] sm:$0xff]  ;;  %v3899_v38 = vld [vmem:[#allocation13_spill] sm:$0xff] }
 0x22d   :  { %2592 = vtanh.f32 %v759_v61  ;;  %v3901_v61 = vld [vmem:[#allocation21_spill] sm:$0xff] }
 0x23a   :  { %v2593_v19 = vpop.eup %2592 }
 0x23b   :  { %v762_v25 = vmul.f32 %v2593_v19, %v761_v2 }
 0x23d   :  { %v3301_v3 = vadd.f32 %v763_v10, %v762_v25 }
 0x23f   :  { %836 = vmatmul.mubr.f32.vlgmr.msra.gmra.mxu0 %v3301_v3  ;;  %2317 = vmatmul.mubr.f32.vlgmr.msra.gmra.mxu1 %v3301_v3 }
 0x240   :  { %941 = vmatpush1.msra.mxu0 %v2877_v7  ;;  %2320 = vmatpush3.msra.mxu1 %v2985_v36 }
 0x241   :  { %942 = vmatprep.subr.mxu0 %v2879_v8  ;;  %2321 = vmatprep.subr.mxu1 %v3886_v5 }
 0x242   :  { %943 = vmatpush1.msra.mxu0 %v2883_v9  ;;  %2322 = vmatpush3.msra.mxu1 %v3007_v42 }
 0x243   :  { %944 = vmatprep.subr.mxu0 %v2890_v11  ;;  %2323 = vmatprep.subr.mxu1 %v3886_v5 }
 0x244   :  { %945 = vmatpush1.msra.mxu0 %v2893_v12  ;;  %2324 = vmatpush3.msra.mxu1 %v3028_v48 }
 0x245   :  { %946 = vmatprep.subr.mxu0 %v2896_v13  ;;  %2325 = vmatprep.subr.mxu1 %v3886_v5 }
 0x246   :  { %947 = vmatpush1.msra.mxu0 %v2900_v14  ;;  %2326 = vmatpush3.msra.mxu1 %v3036_v50 }
 0x247   :  { %948 = vmatprep.subr.mxu0 %v2909_v16  ;;  %2327 = vmatprep.subr.mxu1 %v3886_v5 }
 0x248   :  { %949 = vmatpush1.msra.mxu0 %v2912_v17  ;;  %2328 = vmatpush3.msra.mxu1 %v3042_v51 }
 0x249   :  { %950 = vmatprep.subr.mxu0 %v2915_v18  ;;  %2329 = vmatprep.subr.mxu1 %v3886_v5 }
 0x24a   :  { %951 = vmatpush1.msra.mxu0 %v2923_v20  ;;  %2330 = vmatpush3.msra.mxu1 %v3047_v52 }
 0x24b   :  { %952 = vmatprep.subr.mxu0 %v2932_v22  ;;  %2331 = vmatprep.subr.mxu1 %v3886_v5 }
 0x24c   :  { %953 = vmatpush1.msra.mxu0 %v2935_v23  ;;  %2332 = vmatpush3.msra.mxu1 %v3054_v53 }
 0x24d   :  { %954 = vmatprep.subr.mxu0 %v2938_v24  ;;  %2333 = vmatprep.subr.mxu1 %v3886_v5 }
 0x24e   :  { %955 = vmatpush1.msra.mxu0 %v2946_v26  ;;  %2334 = vmatpush3.msra.mxu1 %v3062_v54 }
 0x24f   :  { %956 = vmatprep.subr.mxu0 %v2955_v28  ;;  %2335 = vmatprep.subr.mxu1 %v3886_v5 }
 0x250   :  { %957 = vmatpush1.msra.mxu0 %v2958_v29  ;;  %2336 = vmatpush3.msra.mxu1 %v3068_v55 }
 0x251   :  { %958 = vmatprep.subr.mxu0 %v2961_v30  ;;  %2337 = vmatprep.subr.mxu1 %v3886_v5 }
 0x252   :  { %959 = vmatpush1.msra.mxu0 %v2966_v31  ;;  %2338 = vmatpush3.msra.mxu1 %v3075_v56 }
 0x253   :  { %960 = vmatprep.subr.mxu0 %v2975_v33  ;;  %2339 = vmatprep.subr.mxu1 %v3886_v5 }
 0x254   :  { %961 = vmatpush1.msra.mxu0 %v2978_v34  ;;  %2340 = vmatpush3.msra.mxu1 %v3081_v57 }
 0x255   :  { %962 = vmatprep.subr.mxu0 %v2982_v35  ;;  %2341 = vmatprep.subr.mxu1 %v3886_v5 }
 0x256   :  { %963 = vmatpush1.msra.mxu0 %v2990_v37  ;;  %2342 = vmatpush3.msra.mxu1 %v3088_v58 }
 0x257   :  { %964 = vmatprep.subr.mxu0 %v2997_v39  ;;  %2343 = vmatprep.subr.mxu1 %v3886_v5 }
 0x258   :  { %965 = vmatpush1.msra.mxu0 %v3000_v40  ;;  %2344 = vmatpush3.msra.mxu1 %v3094_v59 }
 0x259   :  { %966 = vmatprep.subr.mxu0 %v3004_v41  ;;  %2345 = vmatprep.subr.mxu1 %v3886_v5 }
 0x25a   :  { %967 = vmatpush1.msra.mxu0 %v3011_v43  ;;  %2346 = vmatpush3.msra.mxu1 %v3100_v60 }
 0x25b   :  { %968 = vmatprep.subr.mxu0 %v3018_v45  ;;  %2347 = vmatprep.subr.mxu1 %v3886_v5 }
 0x25c   :  { %969 = vmatpush1.msra.mxu0 %v3021_v46  ;;  %2348 = vmatpush3.msra.mxu1 %v3895_v27  ;;  %v3902_v27 = vld [vmem:[#allocation34_spill] sm:$0xff] }
 0x25d   :  { %970 = vmatprep.subr.mxu0 %v3896_v1  ;;  %2349 = vmatprep.subr.mxu1 %v3886_v5 }
 0x25e   :  { %971 = vmatpush1.msra.mxu0 %v3897_v47  ;;  %1004 = vmatprep.mubr.f32.mxu0 %v3886_v5 }
 0x25f   :  { %2350 = vmatpush3.msra.mxu1 %v3898_v15  ;;  %2351 = vmatprep.mubr.msk.f32.mxu1 %vm2797_vm1, %v3886_v5 }
 0x260   :  { %1109 = vmatprep.subr.mxu0 %v3899_v38  ;;  %2354 = vmatprep.subr.mxu1 %v3886_v5 }
 0x2ff   :  { %v837_v32 = vpop.f32.mrf.mxu0  ;;  %v908_v49 = vpop.f32.mrf.mxu1 }
 0x300   :  { %v912_v6 = vadd.f32 %v837_v32, %v3900_v63  ;;  %v926_v38 = vadd.f32 %v3222_v0, %v908_v49  ;;  %v3479_v49 = vld [vmem:[#allocation3 + $0x138] sm:$0xff] }
 0x301   :  { %v2318_v62 = vpop.f32.mrf.mxu1  ;;  %v839_v44 = vpop.f32.mrf.mxu0 }
 0x302   :  { %v2005_v21 = vmul.f32 -1.442695, %v912_v6  ;;  %v919_v4 = vadd.f32 %v839_v44, %v3901_v61 }
 0x304   :  { %2594 = vpow2.f32 %v2005_v21  ;;  %v2006_v2 = vmul.f32 -1.442695, %v919_v4  ;;  %v3483_v4 = vld [vmem:[#allocation3 + $0x128] sm:$0xff] }
 0x306   :  { %2596 = vpow2.f32 %v2006_v2  ;;  %v3487_v2 = vld [vmem:[#allocation3 + $0x120] sm:$0xff] }
 0x311   :  { %v2595_v19 = vpop.eup %2594 }
 0x312   :  { %v916_v25 = vadd.f32 1.0, %v2595_v19  ;;  %v3491_v19 = vld [vmem:[#allocation3 + $0x110] sm:$0xff] }
 0x313   :  { %v2597_v10 = vpop.eup %2596 }
 0x314   :  { %2598 = vrcp.f32 %v916_v25  ;;  %v923_v15 = vadd.f32 1.0, %v2597_v10  ;;  %v3495_v25 = vld [vmem:[#allocation3 + $0x108] sm:$0xff]  ;;  %v3503_v10 = vld [vmem:[#allocation3 + $0xf0] sm:$0xff] }
 0x316   :  { %2600 = vrcp.f32 %v923_v15  ;;  %v3475_v15 = vld [vmem:[#allocation3 + $0x140] sm:$0xff] }
 0x321   :  { %v2599_v47 = vpop.eup %2598 }
 0x322   :  { %v927_v1 = vmul.f32 %v2599_v47, %v926_v38  ;;  %v3472_v47 = vld [vmem:[#allocation3 + $0x160] sm:$0xff]  ;;  %v3511_v38 = vld [vmem:[#allocation3 + $0xd8] sm:$0xff] }
 0x323   :  { %v2601_v63 = vpop.eup %2600 }
 0x324   :  { %v928_v32 = vadd.f32 %v927_v1, %v3902_v27  ;;  %v930_v6 = vsub.f32 1.0, %v2601_v63  ;;  %v932_v44 = vmul.f32 %v2601_v63, %v3301_v3  ;;  %v3462_v3 = vld [vmem:[#allocation3 + $0x178] sm:$0xff]  ;;  %v3469_v1 = vld [vmem:[#allocation3 + $0x150] sm:$0xff]  ;;  %v3527_v63 = vld [vmem:[#allocation3 + $0xa8] sm:$0xff] }
 0x325   :  { %v3465_v27 = vld [vmem:[#allocation3 + $0x158] sm:$0xff] }
 0x326   :  { %2602 = vtanh.f32 %v928_v32  ;;  %v3519_v32 = vld [vmem:[#allocation3 + $0xc0] sm:$0xff] }
 0x333   :  { %v2603_v62 = vpop.eup %2602 }
 0x334   :  { %v931_v21 = vmul.f32 %v2603_v62, %v930_v6  ;;  %v3535_v6 = vld [vmem:[#allocation3 + $0x90] sm:$0xff]  ;;  %v3543_v62 = vld [vmem:[#allocation3 + $0x78] sm:$0xff] }
 0x336   :  { %v3377_v61 = vadd.f32 %v932_v44, %v931_v21  ;;  %v3551_v21 = vld [vmem:[#allocation3 + $0x60] sm:$0xff]  ;;  %v3559_v44 = vld [vmem:[#allocation3 + $0x48] sm:$0xff] }
 0x338   :  { %1005 = vmatmul.mubr.f32.vlgmr.msra.gmra.mxu0 %v3377_v61  ;;  %2352 = vmatmul.mubr.f32.vlgmr.msra.gmra.mxu1 %v3377_v61 }
 0x339   :  { %1110 = vmatpush1.msra.mxu0 %v2877_v7  ;;  %2355 = vmatpush3.msra.mxu1 %v2985_v36  ;;  %v3903_v7 = vld [vmem:[#allocation16_spill] sm:$0xff]  ;;  %v3909_v36 = vld [vmem:[#allocation33_spill] sm:$0xff] }
 0x33a   :  { %1111 = vmatprep.subr.mxu0 %v2879_v8  ;;  %2356 = vmatprep.subr.mxu1 %v3886_v5  ;;  %v3904_v8 = vld [vmem:[#allocation14_spill] sm:$0xff] }
 0x33b   :  { %1112 = vmatpush1.msra.mxu0 %v2883_v9  ;;  %2357 = vmatpush3.msra.mxu1 %v3007_v42  ;;  %v3905_v9 = vld [vmem:[#allocation15_spill] sm:$0xff] }
 0x33c   :  { %1113 = vmatprep.subr.mxu0 %v2890_v11  ;;  %2358 = vmatprep.subr.mxu1 %v3886_v5  ;;  %v3906_v11 = vld [vmem:[#allocation17_spill] sm:$0xff] }
 0x33d   :  { %1114 = vmatpush1.msra.mxu0 %v2893_v12  ;;  %2359 = vmatpush3.msra.mxu1 %v3028_v48  ;;  %v3446_v12 = vld [vmem:[#allocation3 + $0x170] sm:$0xff] }
 0x33e   :  { %1115 = vmatprep.subr.mxu0 %v2896_v13  ;;  %2360 = vmatprep.subr.mxu1 %v3886_v5 }
 0x33f   :  { %1116 = vmatpush1.msra.mxu0 %v2900_v14  ;;  %2361 = vmatpush3.msra.mxu1 %v3036_v50 }
 0x340   :  { %1117 = vmatprep.subr.mxu0 %v2909_v16  ;;  %2362 = vmatprep.subr.mxu1 %v3886_v5  ;;  %v3907_v16 = vld [vmem:[#allocation22_spill] sm:$0xff] }
 0x341   :  { %1118 = vmatpush1.msra.mxu0 %v2912_v17  ;;  %2363 = vmatpush3.msra.mxu1 %v3042_v51 }
 0x342   :  { %1119 = vmatprep.subr.mxu0 %v2915_v18  ;;  %2364 = vmatprep.subr.mxu1 %v3886_v5 }
 0x343   :  { %1120 = vmatpush1.msra.mxu0 %v2923_v20  ;;  %2365 = vmatpush3.msra.mxu1 %v3047_v52 }
 0x344   :  { %1121 = vmatprep.subr.mxu0 %v2932_v22  ;;  %2366 = vmatprep.subr.mxu1 %v3886_v5 }
 0x345   :  { %1122 = vmatpush1.msra.mxu0 %v2935_v23  ;;  %2367 = vmatpush3.msra.mxu1 %v3054_v53  ;;  %v3908_v23 = vld [vmem:[#allocation23_spill] sm:$0xff] }
 0x346   :  { %1123 = vmatprep.subr.mxu0 %v2938_v24  ;;  %2368 = vmatprep.subr.mxu1 %v3886_v5 }
 0x347   :  { %1124 = vmatpush1.msra.mxu0 %v2946_v26  ;;  %2369 = vmatpush3.msra.mxu1 %v3062_v54 }
 0x348   :  { %1125 = vmatprep.subr.mxu0 %v2955_v28  ;;  %2370 = vmatprep.subr.mxu1 %v3886_v5 }
 0x349   :  { %1126 = vmatpush1.msra.mxu0 %v2958_v29  ;;  %2371 = vmatpush3.msra.mxu1 %v3068_v55 }
 0x34a   :  { %1127 = vmatprep.subr.mxu0 %v2961_v30  ;;  %2372 = vmatprep.subr.mxu1 %v3886_v5 }
 0x34b   :  { %1128 = vmatpush1.msra.mxu0 %v2966_v31  ;;  %2373 = vmatpush3.msra.mxu1 %v3075_v56 }
 0x34c   :  { %1129 = vmatprep.subr.mxu0 %v2975_v33  ;;  %2374 = vmatprep.subr.mxu1 %v3886_v5 }
 0x34d   :  { %1130 = vmatpush1.msra.mxu0 %v2978_v34  ;;  %2375 = vmatpush3.msra.mxu1 %v3081_v57 }
 0x34e   :  { %1131 = vmatprep.subr.mxu0 %v2982_v35  ;;  %2376 = vmatprep.subr.mxu1 %v3886_v5 }
 0x34f   :  { %1132 = vmatpush1.msra.mxu0 %v2990_v37  ;;  %2377 = vmatpush3.msra.mxu1 %v3088_v58 }
 0x350   :  { %1133 = vmatprep.subr.mxu0 %v2997_v39  ;;  %2378 = vmatprep.subr.mxu1 %v3886_v5 }
 0x351   :  { %1134 = vmatpush1.msra.mxu0 %v3000_v40  ;;  %2379 = vmatpush3.msra.mxu1 %v3094_v59 }
 0x352   :  { %1135 = vmatprep.subr.mxu0 %v3004_v41  ;;  %2380 = vmatprep.subr.mxu1 %v3886_v5 }
 0x353   :  { %1136 = vmatpush1.msra.mxu0 %v3011_v43  ;;  %2381 = vmatpush3.msra.mxu1 %v3100_v60 }
 0x354   :  { %1137 = vmatprep.subr.mxu0 %v3018_v45  ;;  %2382 = vmatprep.subr.mxu1 %v3886_v5 }
 0x355   :  { %1138 = vmatpush1.msra.mxu0 %v3021_v46  ;;  %2383 = vmatpush3.msra.mxu1 %v3903_v7  ;;  %v3459_v46 = vld [vmem:[#allocation3 + $0x168] sm:$0xff] }
 0x356   :  { %1139 = vmatprep.subr.mxu0 %v3904_v8  ;;  %2384 = vmatprep.subr.mxu1 %v3886_v5  ;;  %v3575_v8 = vld [vmem:[#allocation3 + $0x18] sm:$0xff] }
 0x357   :  { %1140 = vmatpush1.msra.mxu0 %v3905_v9  ;;  %1173 = vmatprep.mubr.f32.mxu0 %v3886_v5  ;;  %v3583_v9 = vld [vmem:[#allocation3] sm:$0xff] }
 0x358   :  { %2385 = vmatpush3.msra.mxu1 %v3906_v11  ;;  %2386 = vmatprep.mubr.msk.f32.mxu1 %vm2797_vm1, %v3886_v5  ;;  %3911 = vst [vmem:[#allocation19_spill] sm:$0xff] %v3583_v9 }
 0x359   :  { %1278 = vmatprep.subr.mxu0 %v3446_v12  ;;  %2389 = vmatprep.subr.mxu1 %v3886_v5 }
 0x3f8   :  { %v1006_v13 = vpop.f32.mrf.mxu0  ;;  %v1077_v14 = vpop.f32.mrf.mxu1 }
 0x3f9   :  { %v1081_v17 = vadd.f32 %v1006_v13, %v3907_v16  ;;  %v1095_v33 = vadd.f32 %v3222_v0, %v1077_v14  ;;  %v3912_v13 = vld [vmem:[#allocation24_spill] sm:$0xff] }
 0x3fa   :  { %v2353_v18 = vpop.f32.mrf.mxu1  ;;  %v1008_v22 = vpop.f32.mrf.mxu0 }
 0x3fb   :  { %v2007_v20 = vmul.f32 -1.442695, %v1081_v17  ;;  %v1088_v24 = vadd.f32 %v1008_v22, %v3908_v23 }
 0x3fd   :  { %2604 = vpow2.f32 %v2007_v20  ;;  %v2008_v26 = vmul.f32 -1.442695, %v1088_v24  ;;  %v3913_v20 = vld [vmem:[#allocation25_spill] sm:$0xff] }
 0x3ff   :  { %2606 = vpow2.f32 %v2008_v26 }
 0x40a   :  { %v2605_v28 = vpop.eup %2604 }
 0x40b   :  { %v1085_v29 = vadd.f32 1.0, %v2605_v28 }
 0x40c   :  { %v2607_v30 = vpop.eup %2606 }
 0x40d   :  { %2608 = vrcp.f32 %v1085_v29  ;;  %v1092_v31 = vadd.f32 1.0, %v2607_v30 }
 0x40f   :  { %2610 = vrcp.f32 %v1092_v31 }
 0x41a   :  { %v2609_v34 = vpop.eup %2608 }
 0x41b   :  { %v1096_v35 = vmul.f32 %v2609_v34, %v1095_v33  ;;  %v3914_v33 = vld [vmem:[#allocation36_spill] sm:$0xff] }
 0x41c   :  { %v2611_v39 = vpop.eup %2610 }
 0x41d   :  { %v1097_v37 = vadd.f32 %v1096_v35, %v3909_v36  ;;  %v1099_v40 = vsub.f32 1.0, %v2611_v39  ;;  %v1101_v43 = vmul.f32 %v2611_v39, %v3377_v61  ;;  %v3567_v61 = vld [vmem:[#allocation3 + $0x30] sm:$0xff] }
 0x41f   :  { %2612 = vtanh.f32 %v1097_v37 }
 0x42c   :  { %v2613_v41 = vpop.eup %2612 }
 0x42d   :  { %v1100_v42 = vmul.f32 %v2613_v41, %v1099_v40 }
 0x42f   :  { %v3455_v45 = vadd.f32 %v1101_v43, %v1100_v42  ;;  %v3610_v42 = vld [vmem:[#allocation3 + $0x148] sm:$0xff]  ;;  %v3616_v43 = vld [vmem:[#allocation3 + $0x130] sm:$0xff] }
 0x431   :  { %1174 = vmatmul.mubr.f32.vlgmr.msra.gmra.mxu0 %v3455_v45  ;;  %2387 = vmatmul.mubr.f32.vlgmr.msra.gmra.mxu1 %v3455_v45 }
 0x432   :  { %1279 = vmatpush1.msra.mxu0 %v3459_v46  ;;  %2390 = vmatpush3.msra.mxu1 %v3462_v3 }
 0x433   :  { %1280 = vmatprep.subr.mxu0 %v3465_v27  ;;  %2391 = vmatprep.subr.mxu1 %v3886_v5 }
 0x434   :  { %1281 = vmatpush1.msra.mxu0 %v3469_v1  ;;  %2392 = vmatpush3.msra.mxu1 %v3472_v47 }
 0x435   :  { %1282 = vmatprep.subr.mxu0 %v3475_v15  ;;  %2393 = vmatprep.subr.mxu1 %v3886_v5 }
 0x436   :  { %1283 = vmatpush1.msra.mxu0 %v3479_v49  ;;  %2394 = vmatpush3.msra.mxu1 %v3028_v48  ;;  %v3499_v48 = vld [vmem:[#allocation3 + $0xf8] sm:$0xff] }
 0x437   :  { %1284 = vmatprep.subr.mxu0 %v3483_v4  ;;  %2395 = vmatprep.subr.mxu1 %v3886_v5 }
 0x438   :  { %1285 = vmatpush1.msra.mxu0 %v3487_v2  ;;  %2396 = vmatpush3.msra.mxu1 %v3036_v50  ;;  %v3507_v50 = vld [vmem:[#allocation3 + $0xe0] sm:$0xff] }
 0x439   :  { %1286 = vmatprep.subr.mxu0 %v3491_v19  ;;  %2397 = vmatprep.subr.mxu1 %v3886_v5 }
 0x43a   :  { %1287 = vmatpush1.msra.mxu0 %v3495_v25  ;;  %2398 = vmatpush3.msra.mxu1 %v3042_v51  ;;  %v3515_v51 = vld [vmem:[#allocation3 + $0xc8] sm:$0xff] }
 0x43b   :  { %1288 = vmatprep.subr.mxu0 %v3499_v48  ;;  %2399 = vmatprep.subr.mxu1 %v3886_v5 }
 0x43c   :  { %1289 = vmatpush1.msra.mxu0 %v3503_v10  ;;  %2400 = vmatpush3.msra.mxu1 %v3047_v52  ;;  %v3523_v52 = vld [vmem:[#allocation3 + $0xb0] sm:$0xff] }
 0x43d   :  { %1290 = vmatprep.subr.mxu0 %v3507_v50  ;;  %2401 = vmatprep.subr.mxu1 %v3886_v5 }
 0x43e   :  { %1291 = vmatpush1.msra.mxu0 %v3511_v38  ;;  %2402 = vmatpush3.msra.mxu1 %v3054_v53  ;;  %v3531_v53 = vld [vmem:[#allocation3 + $0x98] sm:$0xff] }
 0x43f   :  { %1292 = vmatprep.subr.mxu0 %v3515_v51  ;;  %2403 = vmatprep.subr.mxu1 %v3886_v5 }
 0x440   :  { %1293 = vmatpush1.msra.mxu0 %v3519_v32  ;;  %2404 = vmatpush3.msra.mxu1 %v3062_v54  ;;  %v3539_v54 = vld [vmem:[#allocation3 + $0x80] sm:$0xff] }
 0x441   :  { %1294 = vmatprep.subr.mxu0 %v3523_v52  ;;  %2405 = vmatprep.subr.mxu1 %v3886_v5 }
 0x442   :  { %1295 = vmatpush1.msra.mxu0 %v3527_v63  ;;  %2406 = vmatpush3.msra.mxu1 %v3068_v55  ;;  %v3547_v55 = vld [vmem:[#allocation3 + $0x68] sm:$0xff] }
 0x443   :  { %1296 = vmatprep.subr.mxu0 %v3531_v53  ;;  %2407 = vmatprep.subr.mxu1 %v3886_v5 }
 0x444   :  { %1297 = vmatpush1.msra.mxu0 %v3535_v6  ;;  %2408 = vmatpush3.msra.mxu1 %v3075_v56  ;;  %v3555_v56 = vld [vmem:[#allocation3 + $0x50] sm:$0xff] }
 0x445   :  { %1298 = vmatprep.subr.mxu0 %v3539_v54  ;;  %2409 = vmatprep.subr.mxu1 %v3886_v5 }
 0x446   :  { %1299 = vmatpush1.msra.mxu0 %v3543_v62  ;;  %2410 = vmatpush3.msra.mxu1 %v3081_v57  ;;  %v3563_v57 = vld [vmem:[#allocation3 + $0x38] sm:$0xff] }
 0x447   :  { %1300 = vmatprep.subr.mxu0 %v3547_v55  ;;  %2411 = vmatprep.subr.mxu1 %v3886_v5 }
 0x448   :  { %1301 = vmatpush1.msra.mxu0 %v3551_v21  ;;  %2412 = vmatpush3.msra.mxu1 %v3088_v58  ;;  %v3571_v58 = vld [vmem:[#allocation3 + $0x20] sm:$0xff] }
 0x449   :  { %1302 = vmatprep.subr.mxu0 %v3555_v56  ;;  %2413 = vmatprep.subr.mxu1 %v3886_v5 }
 0x44a   :  { %1303 = vmatpush1.msra.mxu0 %v3559_v44  ;;  %2414 = vmatpush3.msra.mxu1 %v3094_v59  ;;  %v3579_v59 = vld [vmem:[#allocation3 + $0x8] sm:$0xff] }
 0x44b   :  { %1304 = vmatprep.subr.mxu0 %v3563_v57  ;;  %2415 = vmatprep.subr.mxu1 %v3886_v5  ;;  %3910 = vst [vmem:[#allocation18_spill] sm:$0xff] %v3579_v59 }
 0x44c   :  { %1305 = vmatpush1.msra.mxu0 %v3567_v61  ;;  %2416 = vmatpush3.msra.mxu1 %v3100_v60 }
 0x44d   :  { %1306 = vmatprep.subr.mxu0 %v3571_v58  ;;  %2417 = vmatprep.subr.mxu1 %v3886_v5 }
 0x44e   :  { %1307 = vmatpush1.msra.mxu0 %v3575_v8  ;;  %2418 = vmatpush3.msra.mxu1 %v3903_v7 }
 0x44f   :  { %1308 = vmatprep.subr.mxu0 %v3579_v59  ;;  %2419 = vmatprep.subr.mxu1 %v3886_v5 }
 0x450   :  { %1309 = vmatpush1.msra.mxu0 %v3583_v9  ;;  %1342 = vmatprep.mubr.f32.mxu0 %v3886_v5 }
 0x451   :  { %2420 = vmatpush3.msra.mxu1 %v3906_v11  ;;  %2421 = vmatprep.mubr.msk.f32.mxu1 %vm2797_vm1, %v3886_v5 }
 0x452   :  { %1447 = vmatprep.subr.mxu0 %v3446_v12  ;;  %2424 = vmatprep.subr.mxu1 %v3886_v5 }
 0x4f1   :  { %v1175_v60 = vpop.f32.mrf.mxu0  ;;  %v1246_v7 = vpop.f32.mrf.mxu1 }
 0x4f2   :  { %v1250_v14 = vadd.f32 %v1175_v60, %v3912_v13  ;;  %v1264_v29 = vadd.f32 %v3222_v0, %v1246_v7  ;;  %v3628_v60 = vld [vmem:[#allocation3 + $0x100] sm:$0xff]  ;;  %v3634_v7 = vld [vmem:[#allocation3 + $0xe8] sm:$0xff]  ;;  %v3640_v13 = vld [vmem:[#allocation3 + $0xd0] sm:$0xff] }
 0x4f3   :  { %v2388_v16 = vpop.f32.mrf.mxu1  ;;  %v1177_v18 = vpop.f32.mrf.mxu0 }
 0x4f4   :  { %v2009_v17 = vmul.f32 -1.442695, %v1250_v14  ;;  %v1257_v22 = vadd.f32 %v1177_v18, %v3913_v20  ;;  %v3646_v14 = vld [vmem:[#allocation3 + $0xb8] sm:$0xff]  ;;  %v3652_v16 = vld [vmem:[#allocation3 + $0xa0] sm:$0xff]  ;;  %v3664_v18 = vld [vmem:[#allocation3 + $0x70] sm:$0xff] }
 0x4f5   :  { %v3670_v20 = vld [vmem:[#allocation3 + $0x58] sm:$0xff] }
 0x4f6   :  { %2614 = vpow2.f32 %v2009_v17  ;;  %v2010_v23 = vmul.f32 -1.442695, %v1257_v22  ;;  %v3658_v17 = vld [vmem:[#allocation3 + $0x88] sm:$0xff]  ;;  %v3676_v22 = vld [vmem:[#allocation3 + $0x40] sm:$0xff] }
 0x4f8   :  { %2616 = vpow2.f32 %v2010_v23  ;;  %v3682_v23 = vld [vmem:[#allocation3 + $0x28] sm:$0xff] }
 0x4f9   :  { %3915 = vst [vmem:[#allocation26_spill] sm:$0xff] %v3682_v23 }
 0x503   :  { %v2615_v11 = vpop.eup %2614 }
 0x504   :  { %v1254_v24 = vadd.f32 1.0, %v2615_v11  ;;  %v3689_v11 = vld [vmem:[#allocation3 + $0x10] sm:$0xff] }
 0x505   :  { %v2617_v26 = vpop.eup %2616  ;;  %3916 = vst [vmem:[#allocation13_spill] sm:$0xff] %v3689_v11 }
 0x506   :  { %2618 = vrcp.f32 %v1254_v24  ;;  %v1261_v28 = vadd.f32 1.0, %v2617_v26 }
 0x508   :  { %2620 = vrcp.f32 %v1261_v28  ;;  %v3917_v28 = vld [vmem:[#allocation27_spill] sm:$0xff] }
 0x513   :  { %v2619_v30 = vpop.eup %2618 }
 0x514   :  { %v1265_v31 = vmul.f32 %v2619_v30, %v1264_v29 }
 0x515   :  { %v2621_v35 = vpop.eup %2620 }
 0x516   :  { %v1266_v34 = vadd.f32 %v1265_v31, %v3914_v33  ;;  %v1268_v36 = vsub.f32 1.0, %v2621_v35  ;;  %v1270_v40 = vmul.f32 %v2621_v35, %v3455_v45  ;;  %v3622_v45 = vld [vmem:[#allocation3 + $0x118] sm:$0xff] }
 0x518   :  { %2622 = vtanh.f32 %v1266_v34  ;;  %v3918_v34 = vld [vmem:[#allocation28_spill] sm:$0xff] }
 0x525   :  { %v2623_v37 = vpop.eup %2622 }
 0x526   :  { %v1269_v39 = vmul.f32 %v2623_v37, %v1268_v36 }
 0x528   :  { %v3597_v41 = vadd.f32 %v1270_v40, %v1269_v39 }
 0x52a   :  { %1343 = vmatmul.mubr.f32.vlgmr.msra.gmra.mxu0 %v3597_v41  ;;  %2422 = vmatmul.mubr.f32.vlgmr.msra.gmra.mxu1 %v3597_v41 }
 0x52b   :  { %1448 = vmatpush1.msra.mxu0 %v3459_v46  ;;  %2425 = vmatpush3.msra.mxu1 %v3462_v3 }
 0x52c   :  { %1449 = vmatprep.subr.mxu0 %v3465_v27  ;;  %2426 = vmatprep.subr.mxu1 %v3886_v5 }
 0x52d   :  { %1450 = vmatpush1.msra.mxu0 %v3469_v1  ;;  %2427 = vmatpush3.msra.mxu1 %v3472_v47 }
 0x52e   :  { %1451 = vmatprep.subr.mxu0 %v3475_v15  ;;  %2428 = vmatprep.subr.mxu1 %v3886_v5 }
 0x52f   :  { %1452 = vmatpush1.msra.mxu0 %v3479_v49  ;;  %2429 = vmatpush3.msra.mxu1 %v3610_v42 }
 0x530   :  { %1453 = vmatprep.subr.mxu0 %v3483_v4  ;;  %2430 = vmatprep.subr.mxu1 %v3886_v5 }
 0x531   :  { %1454 = vmatpush1.msra.mxu0 %v3487_v2  ;;  %2431 = vmatpush3.msra.mxu1 %v3616_v43 }
 0x532   :  { %1455 = vmatprep.subr.mxu0 %v3491_v19  ;;  %2432 = vmatprep.subr.mxu1 %v3886_v5 }
 0x533   :  { %1456 = vmatpush1.msra.mxu0 %v3495_v25  ;;  %2433 = vmatpush3.msra.mxu1 %v3622_v45 }
 0x534   :  { %1457 = vmatprep.subr.mxu0 %v3499_v48  ;;  %2434 = vmatprep.subr.mxu1 %v3886_v5 }
 0x535   :  { %1458 = vmatpush1.msra.mxu0 %v3503_v10  ;;  %2435 = vmatpush3.msra.mxu1 %v3628_v60 }
 0x536   :  { %1459 = vmatprep.subr.mxu0 %v3507_v50  ;;  %2436 = vmatprep.subr.mxu1 %v3886_v5 }
 0x537   :  { %1460 = vmatpush1.msra.mxu0 %v3511_v38  ;;  %2437 = vmatpush3.msra.mxu1 %v3634_v7 }
 0x538   :  { %1461 = vmatprep.subr.mxu0 %v3515_v51  ;;  %2438 = vmatprep.subr.mxu1 %v3886_v5 }
 0x539   :  { %1462 = vmatpush1.msra.mxu0 %v3519_v32  ;;  %2439 = vmatpush3.msra.mxu1 %v3640_v13 }
 0x53a   :  { %1463 = vmatprep.subr.mxu0 %v3523_v52  ;;  %2440 = vmatprep.subr.mxu1 %v3886_v5 }
 0x53b   :  { %1464 = vmatpush1.msra.mxu0 %v3527_v63  ;;  %2441 = vmatpush3.msra.mxu1 %v3646_v14 }
 0x53c   :  { %1465 = vmatprep.subr.mxu0 %v3531_v53  ;;  %2442 = vmatprep.subr.mxu1 %v3886_v5 }
 0x53d   :  { %1466 = vmatpush1.msra.mxu0 %v3535_v6  ;;  %2443 = vmatpush3.msra.mxu1 %v3652_v16 }
 0x53e   :  { %1467 = vmatprep.subr.mxu0 %v3539_v54  ;;  %2444 = vmatprep.subr.mxu1 %v3886_v5 }
 0x53f   :  { %1468 = vmatpush1.msra.mxu0 %v3543_v62  ;;  %2445 = vmatpush3.msra.mxu1 %v3658_v17 }
 0x540   :  { %1469 = vmatprep.subr.mxu0 %v3547_v55  ;;  %2446 = vmatprep.subr.mxu1 %v3886_v5 }
 0x541   :  { %1470 = vmatpush1.msra.mxu0 %v3551_v21  ;;  %2447 = vmatpush3.msra.mxu1 %v3664_v18 }
 0x542   :  { %1471 = vmatprep.subr.mxu0 %v3555_v56  ;;  %2448 = vmatprep.subr.mxu1 %v3886_v5 }
 0x543   :  { %1472 = vmatpush1.msra.mxu0 %v3559_v44  ;;  %2449 = vmatpush3.msra.mxu1 %v3670_v20 }
 0x544   :  { %1473 = vmatprep.subr.mxu0 %v3563_v57  ;;  %2450 = vmatprep.subr.mxu1 %v3886_v5 }
 0x545   :  { %1474 = vmatpush1.msra.mxu0 %v3567_v61  ;;  %2451 = vmatpush3.msra.mxu1 %v3676_v22 }
 0x546   :  { %1475 = vmatprep.subr.mxu0 %v3571_v58  ;;  %2452 = vmatprep.subr.mxu1 %v3886_v5 }
 0x547   :  { %1476 = vmatpush1.msra.mxu0 %v3575_v8  ;;  %2453 = vmatpush3.msra.mxu1 %v3682_v23  ;;  %v3919_v23 = vld [vmem:[#allocation35_spill] sm:$0xff] }
 0x548   :  { %1477 = vmatprep.subr.mxu0 %v3579_v59  ;;  %2454 = vmatprep.subr.mxu1 %v3886_v5 }
 0x549   :  { %1478 = vmatpush1.msra.mxu0 %v3583_v9  ;;  %1511 = vmatprep.mubr.f32.mxu0 %v3886_v5 }
 0x54a   :  { %2455 = vmatpush3.msra.mxu1 %v3689_v11  ;;  %2456 = vmatprep.mubr.msk.f32.mxu1 %vm2797_vm1, %v3886_v5 }
 0x54b   :  { %1616 = vmatprep.subr.mxu0 %v3446_v12  ;;  %2459 = vmatprep.subr.mxu1 %v3886_v5 }
 0x5ea   :  { %v1344_v24 = vpop.f32.mrf.mxu0  ;;  %v1415_v26 = vpop.f32.mrf.mxu1 }
 0x5eb   :  { %v1419_v29 = vadd.f32 %v1344_v24, %v3917_v28  ;;  %v1433_v12 = vadd.f32 %v3222_v0, %v1415_v26  ;;  %v3920_v0 = vld [vmem:[#allocation26_spill] sm:$0xff] }
 0x5ec   :  { %v2423_v30 = vpop.f32.mrf.mxu1  ;;  %v1346_v33 = vpop.f32.mrf.mxu0  ;;  %v1785_v26 = vld [vmem:[#allocation6 + $0x30] sm:$0xff] }
 0x5ed   :  { %v2011_v31 = vmul.f32 -1.442695, %v1419_v29  ;;  %v1426_v35 = vadd.f32 %v1346_v33, %v3918_v34 }
 0x5ef   :  { %2624 = vpow2.f32 %v2011_v31  ;;  %v2012_v36 = vmul.f32 -1.442695, %v1426_v35  ;;  %v1801_v35 = vld [vmem:[#allocation8 + $0x28] sm:$0xff] }
 0x5f1   :  { %2626 = vpow2.f32 %v2012_v36  ;;  %v1784_v36 = vld [vmem:[#allocation6 + $0x28] sm:$0xff] }
 0x5fc   :  { %v2625_v37 = vpop.eup %2624 }
 0x5fd   :  { %v1423_v39 = vadd.f32 1.0, %v2625_v37  ;;  %v1800_v37 = vld [vmem:[#allocation8 + $0x20] sm:$0xff] }
 0x5fe   :  { %v2627_v40 = vpop.eup %2626 }
 0x5ff   :  { %2628 = vrcp.f32 %v1423_v39  ;;  %v1430_v11 = vadd.f32 1.0, %v2627_v40  ;;  %v1783_v39 = vld [vmem:[#allocation6 + $0x20] sm:$0xff]  ;;  %v1799_v40 = vld [vmem:[#allocation8 + $0x18] sm:$0xff] }
 0x601   :  { %2630 = vrcp.f32 %v1430_v11  ;;  %v1802_v11 = vld [vmem:[#allocation8 + $0x30] sm:$0xff] }
 0x60c   :  { %v2629_v9 = vpop.eup %2628 }
 0x60d   :  { %v1434_v59 = vmul.f32 %v2629_v9, %v1433_v12  ;;  %v1793_v9 = vld [vmem:[#allocation6 + $0x70] sm:$0xff]  ;;  %v1782_v12 = vld [vmem:[#allocation6 + $0x18] sm:$0xff] }
 0x60e   :  { %v2631_v28 = vpop.eup %2630 }
 0x60f   :  { %v1435_v24 = vadd.f32 %v1434_v59, %v3919_v23  ;;  %v1437_v29 = vsub.f32 1.0, %v2631_v28  ;;  %v1439_v33 = vmul.f32 %v2631_v28, %v3597_v41  ;;  %v1810_v59 = vld [vmem:[#allocation8 + $0x70] sm:$0xff]  ;;  %v1809_v41 = vld [vmem:[#allocation8 + $0x68] sm:$0xff]  ;;  %v1786_v23 = vld [vmem:[#allocation6 + $0x38] sm:$0xff] }
 0x610   :  { %v1781_v28 = vld [vmem:[#allocation6 + $0x10] sm:$0xff] }
 0x611   :  { %2632 = vtanh.f32 %v1435_v24  ;;  %v1798_v24 = vld [vmem:[#allocation8 + $0x10] sm:$0xff] }
 0x61e   :  { %v2633_v30 = vpop.eup %2632 }
 0x61f   :  { %v1438_v31 = vmul.f32 %v2633_v30, %v1437_v29  ;;  %v1797_v29 = vld [vmem:[#allocation8 + $0x8] sm:$0xff] }
 0x620   :  { %v1780_v30 = vld [vmem:[#allocation6 + $0x8] sm:$0xff] }
 0x621   :  { %v3701_v34 = vadd.f32 %v1439_v33, %v1438_v31  ;;  %v1796_v31 = vld [vmem:[#allocation8] sm:$0xff] }
 0x622   :  { %v1795_v33 = vld [vmem:[%s3839_s5] sm:$0xff] }
 0x623   :  { %1512 = vmatmul.mubr.f32.vlgmr.msra.gmra.mxu0 %v3701_v34  ;;  %2457 = vmatmul.mubr.f32.vlgmr.msra.gmra.mxu1 %v3701_v34 }
 0x624   :  { %1617 = vmatpush1.msra.mxu0 %v3459_v46  ;;  %2460 = vmatpush3.msra.mxu1 %v3462_v3  ;;  %v3921_v46 = vld [vmem:[#allocation18_spill] sm:$0xff]  ;;  %v3922_v3 = vld [vmem:[#allocation19_spill] sm:$0xff] }
 0x625   :  { %1618 = vmatprep.subr.mxu0 %v3465_v27  ;;  %2461 = vmatprep.subr.mxu1 %v3886_v5  ;;  %v3923_v27 = vld [vmem:[#allocation13_spill] sm:$0xff] }
 0x626   :  { %1619 = vmatpush1.msra.mxu0 %v3469_v1  ;;  %2462 = vmatpush3.msra.mxu1 %v3472_v47 }
 0x627   :  { %1620 = vmatprep.subr.mxu0 %v3475_v15  ;;  %2463 = vmatprep.subr.mxu1 %v3886_v5  ;;  %v3924_v15 = vld [vmem:[#allocation29_spill] sm:$0xff] }
 0x628   :  { %1621 = vmatpush1.msra.mxu0 %v3479_v49  ;;  %2464 = vmatpush3.msra.mxu1 %v3610_v42  ;;  %v1792_v42 = vld [vmem:[#allocation6 + $0x68] sm:$0xff] }
 0x629   :  { %1622 = vmatprep.subr.mxu0 %v3483_v4  ;;  %2465 = vmatprep.subr.mxu1 %v3886_v5 }
 0x62a   :  { %1623 = vmatpush1.msra.mxu0 %v3487_v2  ;;  %2466 = vmatpush3.msra.mxu1 %v3616_v43  ;;  %v1808_v43 = vld [vmem:[#allocation8 + $0x60] sm:$0xff] }
 0x62b   :  { %1624 = vmatprep.subr.mxu0 %v3491_v19  ;;  %2467 = vmatprep.subr.mxu1 %v3886_v5 }
 0x62c   :  { %1625 = vmatpush1.msra.mxu0 %v3495_v25  ;;  %2468 = vmatpush3.msra.mxu1 %v3622_v45  ;;  %v3925_v25 = vld [vmem:[#allocation30_spill] sm:$0xff]  ;;  %v1791_v45 = vld [vmem:[#allocation6 + $0x60] sm:$0xff] }
 0x62d   :  { %1626 = vmatprep.subr.mxu0 %v3499_v48  ;;  %2469 = vmatprep.subr.mxu1 %v3886_v5 }
 0x62e   :  { %1627 = vmatpush1.msra.mxu0 %v3503_v10  ;;  %2470 = vmatpush3.msra.mxu1 %v3628_v60  ;;  %v1807_v60 = vld [vmem:[#allocation8 + $0x58] sm:$0xff] }
 0x62f   :  { %1628 = vmatprep.subr.mxu0 %v3507_v50  ;;  %2471 = vmatprep.subr.mxu1 %v3886_v5 }
 0x630   :  { %1629 = vmatpush1.msra.mxu0 %v3511_v38  ;;  %2472 = vmatpush3.msra.mxu1 %v3634_v7  ;;  %v1790_v7 = vld [vmem:[#allocation6 + $0x58] sm:$0xff] }
 0x631   :  { %1630 = vmatprep.subr.mxu0 %v3515_v51  ;;  %2473 = vmatprep.subr.mxu1 %v3886_v5 }
 0x632   :  { %1631 = vmatpush1.msra.mxu0 %v3519_v32  ;;  %2474 = vmatpush3.msra.mxu1 %v3640_v13  ;;  %v1806_v13 = vld [vmem:[#allocation8 + $0x50] sm:$0xff] }
 0x633   :  { %1632 = vmatprep.subr.mxu0 %v3523_v52  ;;  %2475 = vmatprep.subr.mxu1 %v3886_v5  ;;  %v3777_v52 = vld [vmem:[%s3838_s4] ss:$0 sm:$0xff] }
 0x634   :  { %1633 = vmatpush1.msra.mxu0 %v3527_v63  ;;  %2476 = vmatpush3.msra.mxu1 %v3646_v14  ;;  %v1789_v14 = vld [vmem:[#allocation6 + $0x50] sm:$0xff] }
 0x635   :  { %1634 = vmatprep.subr.mxu0 %v3531_v53  ;;  %2477 = vmatprep.subr.mxu1 %v3886_v5 }
 0x636   :  { %1635 = vmatpush1.msra.mxu0 %v3535_v6  ;;  %2478 = vmatpush3.msra.mxu1 %v3652_v16  ;;  %v1805_v16 = vld [vmem:[#allocation8 + $0x48] sm:$0xff] }
 0x637   :  { %1636 = vmatprep.subr.mxu0 %v3539_v54  ;;  %2479 = vmatprep.subr.mxu1 %v3886_v5  ;;  %v3926_v54 = vld [vmem:[#allocation38_spill] sm:$0xff] }
 0x638   :  { %1637 = vmatpush1.msra.mxu0 %v3543_v62  ;;  %2480 = vmatpush3.msra.mxu1 %v3658_v17  ;;  %v1788_v17 = vld [vmem:[#allocation6 + $0x48] sm:$0xff] }
 0x639   :  { %1638 = vmatprep.subr.mxu0 %v3547_v55  ;;  %2481 = vmatprep.subr.mxu1 %v3886_v5 }
 0x63a   :  { %1639 = vmatpush1.msra.mxu0 %v3551_v21  ;;  %2482 = vmatpush3.msra.mxu1 %v3664_v18  ;;  %v1804_v18 = vld [vmem:[#allocation8 + $0x40] sm:$0xff] }
 0x63b   :  { %1640 = vmatprep.subr.mxu0 %v3555_v56  ;;  %2483 = vmatprep.subr.mxu1 %v3886_v5 }
 0x63c   :  { %1641 = vmatpush1.msra.mxu0 %v3559_v44  ;;  %2484 = vmatpush3.msra.mxu1 %v3670_v20  ;;  %v1787_v20 = vld [vmem:[#allocation6 + $0x40] sm:$0xff] }
 0x63d   :  { %1642 = vmatprep.subr.mxu0 %v3563_v57  ;;  %2485 = vmatprep.subr.mxu1 %v3886_v5 }
 0x63e   :  { %1643 = vmatpush1.msra.mxu0 %v3567_v61  ;;  %2486 = vmatpush3.msra.mxu1 %v3676_v22  ;;  %v1803_v22 = vld [vmem:[#allocation8 + $0x38] sm:$0xff] }
 0x63f   :  { %1644 = vmatprep.subr.mxu0 %v3571_v58  ;;  %2487 = vmatprep.subr.mxu1 %v3886_v5  ;;  %v1811_v58 = vld [vmem:[#allocation8 + $0x78] sm:$0xff] }
 0x640   :  { %1645 = vmatpush1.msra.mxu0 %v3575_v8  ;;  %2488 = vmatpush3.msra.mxu1 %v3920_v0  ;;  %v1794_v8 = vld [vmem:[#allocation6 + $0x78] sm:$0xff] }
 0x641   :  { %1646 = vmatprep.subr.mxu0 %v3921_v46  ;;  %2489 = vmatprep.subr.mxu1 %v3886_v5 }
 0x642   :  { %1647 = vmatpush1.msra.mxu0 %v3922_v3  ;;  %1680 = vmatprep.mubr.f32.mxu0 %v3886_v5  ;;  %v3927_v3 = vld [vmem:[#allocation31_spill] sm:$0xff] }
 0x643   :  { %2490 = vmatpush3.msra.mxu1 %v3923_v27  ;;  %2491 = vmatprep.mubr.msk.f32.mxu1 %vm2797_vm1, %v3886_v5 }
 0x644   :  { %2494 = vmatprep.subr.mxu0 %v3886_v5  ;;  %2529 = vmatprep.subr.mxu1 %v3886_v5 }
 0x6e3   :  { %v1513_v1 = vpop.f32.mrf.mxu0  ;;  %v1584_v47 = vpop.f32.mrf.mxu1 }
 0x6e4   :  { %v1588_v49 = vadd.f32 %v1513_v1, %v3924_v15  ;;  %v1602_v63 = vadd.f32 %v3777_v52, %v1584_v47 }
 0x6e5   :  { %v2458_v4 = vpop.f32.mrf.mxu1  ;;  %v1515_v19 = vpop.f32.mrf.mxu0 }
 0x6e6   :  { %v2013_v2 = vmul.f32 -1.442695, %v1588_v49  ;;  %v1595_v48 = vadd.f32 %v1515_v19, %v3925_v25  ;;  %v3928_v49 = vld [vmem:[#allocation32_spill] sm:$0xff] }
 0x6e8   :  { %2634 = vpow2.f32 %v2013_v2  ;;  %v2014_v10 = vmul.f32 -1.442695, %v1595_v48 }
 0x6ea   :  { %2636 = vpow2.f32 %v2014_v10 }
 0x6f5   :  { %v2635_v50 = vpop.eup %2634 }
 0x6f6   :  { %v1592_v38 = vadd.f32 1.0, %v2635_v50 }
 0x6f7   :  { %v2637_v51 = vpop.eup %2636 }
 0x6f8   :  { %2638 = vrcp.f32 %v1592_v38  ;;  %v1599_v32 = vadd.f32 1.0, %v2637_v51  ;;  %v3929_v51 = vld [vmem:[#allocation37_spill] sm:$0xff] }
 0x6fa   :  { %2640 = vrcp.f32 %v1599_v32 }
 0x705   :  { %v2639_v53 = vpop.eup %2638 }
 0x706   :  { %v1603_v6 = vmul.f32 %v2639_v53, %v1602_v63 }
 0x707   :  { %v2641_v55 = vpop.eup %2640 }
 0x708   :  { %v1604_v62 = vadd.f32 %v1603_v6, %v3926_v54  ;;  %v1606_v21 = vsub.f32 1.0, %v2641_v55  ;;  %v1608_v57 = vmul.f32 %v2641_v55, %v3701_v34  ;;  %v1779_v34 = vld [vmem:[#allocation6] sm:$0xff] }
 0x70a   :  { %2642 = vtanh.f32 %v1604_v62 }
 0x717   :  { %v2643_v56 = vpop.eup %2642 }
 0x718   :  { %v1607_v44 = vmul.f32 %v2643_v56, %v1606_v21 }
 0x71a   :  { %v3782_v61 = vadd.f32 %v1608_v57, %v1607_v44 }
 0x71c   :  { %1681 = vmatmul.mubr.f32.vlgmr.msra.gmra.mxu0 %v3782_v61  ;;  %2492 = vmatmul.mubr.f32.vlgmr.msra.gmra.mxu1 %v3782_v61 }
 0x71d   :  { %2526 = vmatprep.mubr.msk.f32.mxu0 %vm2797_vm1, %v3886_v5  ;;  %2561 = vmatprep.mubr.msk.f32.mxu1 %vm2797_vm1, %v3886_v5 }
 0x71e   :  { %2495 = vmatpush3.msra.mxu0 %v1811_v58  ;;  %2530 = vmatpush3.msra.mxu1 %v1794_v8 }
 0x71f   :  { %2496 = vmatprep.subr.mxu0 %v3886_v5  ;;  %2531 = vmatprep.subr.mxu1 %v3886_v5 }
 0x720   :  { %2497 = vmatpush3.msra.mxu0 %v1810_v59  ;;  %2532 = vmatpush3.msra.mxu1 %v1793_v9 }
 0x721   :  { %2498 = vmatprep.subr.mxu0 %v3886_v5  ;;  %2533 = vmatprep.subr.mxu1 %v3886_v5 }
 0x722   :  { %2499 = vmatpush3.msra.mxu0 %v1809_v41  ;;  %2534 = vmatpush3.msra.mxu1 %v1792_v42 }
 0x723   :  { %2500 = vmatprep.subr.mxu0 %v3886_v5  ;;  %2535 = vmatprep.subr.mxu1 %v3886_v5 }
 0x724   :  { %2501 = vmatpush3.msra.mxu0 %v1808_v43  ;;  %2536 = vmatpush3.msra.mxu1 %v1791_v45 }
 0x725   :  { %2502 = vmatprep.subr.mxu0 %v3886_v5  ;;  %2537 = vmatprep.subr.mxu1 %v3886_v5 }
 0x726   :  { %2503 = vmatpush3.msra.mxu0 %v1807_v60  ;;  %2538 = vmatpush3.msra.mxu1 %v1790_v7 }
 0x727   :  { %2504 = vmatprep.subr.mxu0 %v3886_v5  ;;  %2539 = vmatprep.subr.mxu1 %v3886_v5 }
 0x728   :  { %2505 = vmatpush3.msra.mxu0 %v1806_v13  ;;  %2540 = vmatpush3.msra.mxu1 %v1789_v14 }
 0x729   :  { %2506 = vmatprep.subr.mxu0 %v3886_v5  ;;  %2541 = vmatprep.subr.mxu1 %v3886_v5 }
 0x72a   :  { %2507 = vmatpush3.msra.mxu0 %v1805_v16  ;;  %2542 = vmatpush3.msra.mxu1 %v1788_v17 }
 0x72b   :  { %2508 = vmatprep.subr.mxu0 %v3886_v5  ;;  %2543 = vmatprep.subr.mxu1 %v3886_v5 }
 0x72c   :  { %2509 = vmatpush3.msra.mxu0 %v1804_v18  ;;  %2544 = vmatpush3.msra.mxu1 %v1787_v20 }
 0x72d   :  { %2510 = vmatprep.subr.mxu0 %v3886_v5  ;;  %2545 = vmatprep.subr.mxu1 %v3886_v5 }
 0x72e   :  { %2511 = vmatpush3.msra.mxu0 %v1803_v22  ;;  %2546 = vmatpush3.msra.mxu1 %v1786_v23 }
 0x72f   :  { %2512 = vmatprep.subr.mxu0 %v3886_v5  ;;  %2547 = vmatprep.subr.mxu1 %v3886_v5 }
 0x730   :  { %2513 = vmatpush3.msra.mxu0 %v1802_v11  ;;  %2548 = vmatpush3.msra.mxu1 %v1785_v26 }
 0x731   :  { %2514 = vmatprep.subr.mxu0 %v3886_v5  ;;  %2549 = vmatprep.subr.mxu1 %v3886_v5 }
 0x732   :  { %2515 = vmatpush3.msra.mxu0 %v1801_v35  ;;  %2550 = vmatpush3.msra.mxu1 %v1784_v36 }
 0x733   :  { %2516 = vmatprep.subr.mxu0 %v3886_v5  ;;  %2551 = vmatprep.subr.mxu1 %v3886_v5 }
 0x734   :  { %2517 = vmatpush3.msra.mxu0 %v1800_v37  ;;  %2552 = vmatpush3.msra.mxu1 %v1783_v39 }
 0x735   :  { %2518 = vmatprep.subr.mxu0 %v3886_v5  ;;  %2553 = vmatprep.subr.mxu1 %v3886_v5 }
 0x736   :  { %2519 = vmatpush3.msra.mxu0 %v1799_v40  ;;  %2554 = vmatpush3.msra.mxu1 %v1782_v12 }
 0x737   :  { %2520 = vmatprep.subr.mxu0 %v3886_v5  ;;  %2555 = vmatprep.subr.mxu1 %v3886_v5 }
 0x738   :  { %2521 = vmatpush3.msra.mxu0 %v1798_v24  ;;  %2556 = vmatpush3.msra.mxu1 %v1781_v28 }
 0x739   :  { %2522 = vmatprep.subr.mxu0 %v3886_v5  ;;  %2557 = vmatprep.subr.mxu1 %v3886_v5 }
 0x73a   :  { %2523 = vmatpush3.msra.mxu0 %v1797_v29  ;;  %2558 = vmatpush3.msra.mxu1 %v1780_v30 }
 0x73b   :  { %2524 = vmatprep.subr.mxu0 %v3886_v5  ;;  %2559 = vmatprep.subr.mxu1 %v3886_v5 }
 0x73c   :  { %2525 = vmatpush3.msra.mxu0 %v1796_v31  ;;  %2560 = vmatpush3.msra.mxu1 %v1779_v34 }
 0x73d   :  { %2527 = vmatmul.mubr.f32.vlgmr.msra.gmra.mxu0 %v1795_v33 }
 0x7dc   :  { %v1682_v0 = vpop.f32.mrf.mxu0  ;;  %v1753_v46 = vpop.f32.mrf.mxu1 }
 0x7dd   :  { %v1757_v27 = vadd.f32 %v1682_v0, %v3927_v3  ;;  %v1771_v5 = vadd.f32 %v3777_v52, %v1753_v46  ;;  %v2017_v52 = vld [vmem:[%s3842_s8] ss:$0 sm:$0xff] }
 0x7de   :  { %v2493_v1 = vpop.f32.mrf.mxu1  ;;  %v1684_v15 = vpop.f32.mrf.mxu0 }
 0x7df   :  { %v2015_v47 = vmul.f32 -1.442695, %v1757_v27  ;;  %v1764_v4 = vadd.f32 %v1684_v15, %v3928_v49 }
 0x7e1   :  { %2644 = vpow2.f32 %v2015_v47  ;;  %v2016_v2 = vmul.f32 -1.442695, %v1764_v4 }
 0x7e3   :  { %2646 = vpow2.f32 %v2016_v2 }
 0x7ee   :  { %v2645_v19 = vpop.eup %2644 }
 0x7ef   :  { %v1761_v25 = vadd.f32 1.0, %v2645_v19 }
 0x7f0   :  { %v2647_v48 = vpop.eup %2646 }
 0x7f1   :  { %2648 = vrcp.f32 %v1761_v25  ;;  %v1768_v10 = vadd.f32 1.0, %v2647_v48 }
 0x7f3   :  { %2650 = vrcp.f32 %v1768_v10 }
 0x7fd   :  { %v1878_v21 = vpop.f32.mrf.mxu0 }
 0x7fe   :  { %v2649_v50 = vpop.eup %2648 }
 0x7ff   :  { %v1772_v38 = vmul.f32 %v2649_v50, %v1771_v5  ;;  %v2528_v56 = vpop.f32.mrf.mxu0 }
 0x800   :  { %v2651_v63 = vpop.eup %2650 }
 0x801   :  { %v1773_v32 = vadd.f32 %v1772_v38, %v3929_v51  ;;  %v1775_v53 = vsub.f32 1.0, %v2651_v63  ;;  %v1777_v62 = vmul.f32 %v2651_v63, %v3782_v61 }
 0x803   :  { %2652 = vtanh.f32 %v1773_v32 }
 0x810   :  { %v2653_v6 = vpop.eup %2652 }
 0x811   :  { %v1776_v54 = vmul.f32 %v2653_v6, %v1775_v53 }
 0x813   :  { %v1778_v55 = vadd.f32 %v1777_v62, %v1776_v54 }
 0x815   :  { %2562 = vmatmul.mubr.f32.vlgmr.msra.gmra.mxu1 %v1778_v55 }
 0x8d5   :  { %v1948_v44 = vpop.f32.mrf.mxu1 }
 0x8d6   :  { %v1949_v57 = vadd.f32 %v1948_v44, %v1878_v21 }
 0x8d7   :  { %v2563_v58 = vpop.f32.mrf.mxu1 }
 0x8d8   :  { %v1959_v8 = vadd.f32 %v2017_v52, %v1949_v57 }
 0x8da   :  { %1960 = vst [vmem:[#allocation9] sm:$0xff] %v1959_v8 }
 0x8db   :  { %2774 = shalt.err (!%p2771_p5)
}
 0x8dc   :  { %1970 = dma.vmem_to_hbm [thread:$0]  %s1968_s14, 128, %s3843_s9, [#allocation5]  }
 0x8dd   :  { %2787 = dma.done.wait [#allocation5], 128  }
 0x8de   :  { %2788 = vsyncadd [#allocation5], 4294967168 }
 0x8df   :  { %1974 = vsyncpa [#allocation4], 1 }
 0x8e0   :  { %1975 = vsyncpa [#allocation7], 1 }
 0x8e1   :  { %1976 = vsyncpa [#allocation5], 1 }

</bundles_post_ra>
